<compile_context>
chip_gen: v6e
topology: v6e:2x2x1
jax: 0.10.0
libtpu: 0.0.40
codegen_flags: <defaults>
</compile_context>

<pallas_src>
import functools

import jax
import jax.numpy as jnp
from jax import lax
from jax.experimental import pallas as pl
from jax.experimental.pallas import tpu as pltpu


# ---------------------------------------------------------------------------
# Fused kernel: fc1 -> normalize -> Gram -> in-kernel kNN -> EdgeConv -> fc2
#               -> residual, all on VMEM-resident tiles, one batch per program
# ---------------------------------------------------------------------------
def _grapher_kernel(x_ref, w1_ref, b1_ref, wi_ref, wj_ref, be_ref,
                    w2_ref, b2_ref, o_ref, *, k):
    # x_ref: (1, C, N) channels-first slab of one batch element.
    x_cn = x_ref[0].astype(jnp.float32)                   # (C, N)
    x = x_cn.T                                            # (N, C) nodes
    n = x.shape[0]

    # ---- fc1: depthwise + pointwise 1x1x1 conv + BN, folded into W1/b1 ----
    h = jnp.dot(x.astype(jnp.bfloat16), w1_ref[...],
                preferred_element_type=jnp.float32) + b1_ref[...]          # (N, C)

    # ---- dense kNN graph: L2 normalize + Gram matrix (dist = 2 - 2*sim) ----
    ss = jnp.sum(h * h, axis=-1, keepdims=True)
    hn = (h * lax.rsqrt(jnp.maximum(ss, 1e-24))).astype(jnp.bfloat16)
    sim = lax.dot_general(hn, hn, (((1,), (1,)), ((), ())),
                          preferred_element_type=jnp.float32)              # (N, N)

    # ---- collapsed EdgeConv:  out_i = relu(base_i + max_{j in N(i)} proj_j)
    hb = h.astype(jnp.bfloat16)
    proj = jnp.dot(hb, wj_ref[...], preferred_element_type=jnp.float32)    # (N, 2C)
    base = (jnp.dot(hb, wi_ref[...], preferred_element_type=jnp.float32)
            + be_ref[...] - proj)                                          # (N, 2C)

    # In-kernel top-k: k passes of row-argmax -> one-hot -> MXU gather -> mask.
    col = lax.broadcasted_iota(jnp.int32, (n, n), 1).astype(jnp.float32)
    neg_inf = jnp.float32(-jnp.inf)
    nb_max = jnp.full(proj.shape, neg_inf, jnp.float32)
    sim_c = sim
    for _ in range(k):                                     # static unroll, k = 9
        row_max = jnp.max(sim_c, axis=-1, keepdims=True)                   # (N, 1)
        is_max = sim_c >= row_max
        # first occurrence tie-break (matches lax.top_k lowest-index-first)
        first = jnp.min(jnp.where(is_max, col, jnp.float32(n)),
                        axis=-1, keepdims=True)                            # (N, 1)
        onehot = col == first                                              # (N, N)
        gathered = jnp.dot(onehot.astype(jnp.float32), proj,
                           preferred_element_type=jnp.float32)             # (N, 2C)
        nb_max = jnp.maximum(nb_max, gathered)
        sim_c = jnp.where(onehot, neg_inf, sim_c)

    g = jnp.maximum(base + nb_max, 0.0)                                    # (N, 2C)

    # ---- fc2 (folded) + residual with the module input ----
    out = jnp.dot(g.astype(jnp.bfloat16), w2_ref[...],
                  preferred_element_type=jnp.float32) + b2_ref[...]        # (N, C)
    out = out + x
    o_ref[0] = out.T.astype(o_ref.dtype)                                   # (C, N)


def fused_grapher3d(x_cn, w1, b1, wi, wj, be, w2, b2, *, k):
    B, C, N = x_cn.shape
    C2 = 2 * C

    def full_spec(shape):
        return pl.BlockSpec(shape, lambda b: (0,) * len(shape))

    return pl.pallas_call(
        functools.partial(_grapher_kernel, k=k),
        out_shape=jax.ShapeDtypeStruct((B, C, N), x_cn.dtype),
        grid=(B,),
        in_specs=[
            pl.BlockSpec((1, C, N), lambda b: (b, 0, 0)),   # x
            full_spec((C, C)),                              # W1 (bf16)
            full_spec((1, C)),                              # b1
            full_spec((C, C2)),                             # Wi (bf16)
            full_spec((C, C2)),                             # Wj (bf16)
            full_spec((1, C2)),                             # edge bias
            full_spec((C2, C)),                             # W2 (bf16)
            full_spec((1, C)),                              # b2
        ],
        out_specs=pl.BlockSpec((1, C, N), lambda b: (b, 0, 0)),
        compiler_params=pltpu.CompilerParams(
            dimension_semantics=("parallel",)),             # B=2 -> both TCs on v7x
    )(x_cn, w1, b1, wi, wj, be, w2, b2)


# ---------------------------------------------------------------------------
# Parameters (deterministic synthetic init — shapes follow Grapher3D.__init__)
# ---------------------------------------------------------------------------
def init_params(key, C):
    ks = jax.random.split(key, 16)
    nrm = lambda k, shape, s=0.1: s * jax.random.normal(k, shape, jnp.float32)
    p = {}
    # fc1: DepthWiseConv3d(C, C, 1) + BatchNorm3d(C)
    p["dw1_scale"] = 1.0 + nrm(ks[0], (C,))
    p["dw1_bias"] = nrm(ks[1], (C,))
    p["pw1_w"] = nrm(ks[2], (C, C))
    p["pw1_b"] = nrm(ks[3], (C,))
    g1, b1 = 1.0 + nrm(ks[4], (C,)), nrm(ks[5], (C,))
    m1, v1 = nrm(ks[6], (C,)), 1.0 + jnp.abs(nrm(ks[7], (C,)))
    p["bn1_scale"] = g1 / jnp.sqrt(v1 + 1e-5)
    p["bn1_shift"] = b1 - m1 * p["bn1_scale"]
    # graph_conv EdgeConv nn: BasicConv([2C, 2C]) = Conv 1x1 (bias) + ReLU
    p["edge_w"] = nrm(ks[8], (2 * C, 2 * C))
    p["edge_b"] = nrm(ks[9], (2 * C,))
    # fc2: DepthWiseConv3d(2C, C, 1) + BatchNorm3d(C)
    p["dw2_scale"] = 1.0 + nrm(ks[10], (2 * C,))
    p["dw2_bias"] = nrm(ks[11], (2 * C,))
    p["pw2_w"] = nrm(ks[12], (C, 2 * C))
    p["pw2_b"] = nrm(ks[13], (C,))
    g2, b2 = 1.0 + nrm(ks[14], (C,)), nrm(ks[15], (C,))
    p["bn2_scale"] = g2 / jnp.sqrt(1.0 + 1e-5)   # running stats: mean=0, var=1
    p["bn2_shift"] = b2
    return p


def fold_params(p, C):
    """Fold depthwise affine + pointwise bias + BN into one weight + bias."""
    wt1 = p["pw1_w"].T                                        # (C, C)
    w1 = (p["dw1_scale"][:, None] * wt1) * p["bn1_scale"][None, :]
    b1 = (p["dw1_bias"] @ wt1 + p["pw1_b"]) * p["bn1_scale"] + p["bn1_shift"]

    wi = p["edge_w"][:, :C].T                                 # (C, 2C) on x_i
    wj = p["edge_w"][:, C:].T                                 # (C, 2C) on (x_j - x_i)
    be = p["edge_b"]

    wt2 = p["pw2_w"].T                                        # (2C, C)
    w2 = (p["dw2_scale"][:, None] * wt2) * p["bn2_scale"][None, :]
    b2 = (p["dw2_bias"] @ wt2 + p["pw2_b"]) * p["bn2_scale"] + p["bn2_shift"]

    row = lambda a: a.reshape(1, -1).astype(jnp.float32)
    bf = lambda a: a.astype(jnp.bfloat16)                     # MXU operands in bf16
    return dict(w1=bf(w1), b1=row(b1), wi=bf(wi), wj=bf(wj), be=row(be),
                w2=bf(w2), b2=row(b2))


# ---------------------------------------------------------------------------
# Full forward (matches Grapher3D.forward), NCDHW in / NCDHW out
# ---------------------------------------------------------------------------
def grapher3d_forward(x, params, k=9):
    B, C, D, H, W = x.shape
    N = D * H * W
    fp = fold_params(params, C)
    x_cn = x.reshape(B, C, N)            # free reshape; node transpose happens in-kernel
    out_cn = fused_grapher3d(x_cn, fp["w1"], fp["b1"], fp["wi"], fp["wj"],
                             fp["be"], fp["w2"], fp["b2"], k=k)
    return out_cn.reshape(B, C, D, H, W)


if __name__ == "__main__":
    key = jax.random.PRNGKey(0)
    kx, kp = jax.random.split(key)
    B, C, D, H, W = 2, 16, 4, 4, 4        # N = 64 nodes, kernel_size (kNN) = 9
    x = jax.random.normal(kx, (B, C, D, H, W), jnp.float32)
    params = init_params(kp, C)

    out = grapher3d_forward(x, params, k=9)
    out = jax.block_until_ready(out)
    assert out.shape == (B, C, D, H, W)
    assert jnp.all(jnp.isfinite(out))
    print("KERNEL_OK")
</pallas_src>

<mosaic_0001>
module attributes {stable_mosaic.version = 11 : i64} {
  func.func @_grapher_kernel(%arg0: i32, %arg1: memref<1x16x64xf32, #tpu.memory_space<vmem>>, %arg2: memref<16x16xbf16, #tpu.memory_space<vmem>>, %arg3: memref<1x16xf32, #tpu.memory_space<vmem>>, %arg4: memref<16x32xbf16, #tpu.memory_space<vmem>>, %arg5: memref<16x32xbf16, #tpu.memory_space<vmem>>, %arg6: memref<1x32xf32, #tpu.memory_space<vmem>>, %arg7: memref<32x16xbf16, #tpu.memory_space<vmem>>, %arg8: memref<1x16xf32, #tpu.memory_space<vmem>>, %arg9: memref<1x16x64xf32, #tpu.memory_space<vmem>>) attributes {dimension_semantics = [#tpu.dimension_semantics<parallel>], iteration_bounds = array<i64: 2>, scalar_prefetch = 0 : i64, scratch_operands = 0 : i64, tpu.core_type = #tpu.core_type<tc>, window_params = [{transform_indices = @transform_0, window_bounds = array<i64: 1, 16, 64>}, {pipeline_mode = #tpu.pipeline_mode<synchronous>, transform_indices = @transform_1, window_bounds = array<i64: 16, 16>}, {pipeline_mode = #tpu.pipeline_mode<synchronous>, transform_indices = @transform_2, window_bounds = array<i64: 1, 16>}, {pipeline_mode = #tpu.pipeline_mode<synchronous>, transform_indices = @transform_3, window_bounds = array<i64: 16, 32>}, {pipeline_mode = #tpu.pipeline_mode<synchronous>, transform_indices = @transform_4, window_bounds = array<i64: 16, 32>}, {pipeline_mode = #tpu.pipeline_mode<synchronous>, transform_indices = @transform_5, window_bounds = array<i64: 1, 32>}, {pipeline_mode = #tpu.pipeline_mode<synchronous>, transform_indices = @transform_6, window_bounds = array<i64: 32, 16>}, {pipeline_mode = #tpu.pipeline_mode<synchronous>, transform_indices = @transform_7, window_bounds = array<i64: 1, 16>}, {transform_indices = @transform_8, window_bounds = array<i64: 1, 16, 64>}]} {
    %c0 = arith.constant 0 : index
    %c0_0 = arith.constant 0 : index
    %c0_1 = arith.constant 0 : index
    %0 = vector.load %arg1[%c0, %c0_0, %c0_1] : memref<1x16x64xf32, #tpu.memory_space<vmem>>, vector<1x16x64xf32>
    %1 = vector.shape_cast %0 : vector<1x16x64xf32> to vector<16x64xf32>
    %2 = tpu.transpose %1, [1, 0] : vector<16x64xf32> -> vector<64x16xf32>
    %3 = arith.truncf %2 : vector<64x16xf32> to vector<64x16xbf16>
    %c0_2 = arith.constant 0 : index
    %c0_3 = arith.constant 0 : index
    %4 = vector.load %arg2[%c0_2, %c0_3] : memref<16x16xbf16, #tpu.memory_space<vmem>>, vector<16x16xbf16>
    %cst = arith.constant dense<0.000000e+00> : vector<64x16xf32>
    %5 = tpu.matmul %3, %4, %cst {dimension_numbers = #tpu.dot_dimension_numbers<[1], [0], [0], [1], [0, 0, 1, 1], [], []>} : vector<64x16xbf16>, vector<16x16xbf16>, vector<64x16xf32> -> vector<64x16xf32>
    %c0_4 = arith.constant 0 : index
    %c0_5 = arith.constant 0 : index
    %6 = vector.load %arg3[%c0_4, %c0_5] : memref<1x16xf32, #tpu.memory_space<vmem>>, vector<1x16xf32>
    %7 = vector.broadcast %6 : vector<1x16xf32> to vector<64x16xf32>
    %8 = arith.addf %5, %7 : vector<64x16xf32>
    %9 = arith.mulf %8, %8 : vector<64x16xf32>
    %cst_6 = arith.constant dense<0.000000e+00> : vector<64xf32>
    %10 = vector.multi_reduction <add>, %9, %cst_6 [1] : vector<64x16xf32> to vector<64xf32>
    %11 = vector.shape_cast %10 : vector<64xf32> to vector<64x1xf32>
    %cst_7 = arith.constant 1.000000e-24 : f32
    %12 = vector.broadcast %cst_7 : f32 to vector<64x1xf32>
    %13 = arith.maximumf %11, %12 : vector<64x1xf32>
    %14 = math.rsqrt %13 : vector<64x1xf32>
    %15 = vector.broadcast %14 : vector<64x1xf32> to vector<64x16xf32>
    %16 = arith.mulf %8, %15 : vector<64x16xf32>
    %17 = arith.truncf %16 : vector<64x16xf32> to vector<64x16xbf16>
    %cst_8 = arith.constant dense<0.000000e+00> : vector<64x64xf32>
    %18 = tpu.matmul %17, %17, %cst_8 {dimension_numbers = #tpu.dot_dimension_numbers<[1], [1], [0], [0], [0, 0, 1, 0], [], []>} : vector<64x16xbf16>, vector<64x16xbf16>, vector<64x64xf32> -> vector<64x64xf32>
    %19 = arith.truncf %8 : vector<64x16xf32> to vector<64x16xbf16>
    %c0_9 = arith.constant 0 : index
    %c0_10 = arith.constant 0 : index
    %20 = vector.load %arg5[%c0_9, %c0_10] : memref<16x32xbf16, #tpu.memory_space<vmem>>, vector<16x32xbf16>
    %cst_11 = arith.constant dense<0.000000e+00> : vector<64x32xf32>
    %21 = tpu.matmul %19, %20, %cst_11 {dimension_numbers = #tpu.dot_dimension_numbers<[1], [0], [0], [1], [0, 0, 1, 1], [], []>} : vector<64x16xbf16>, vector<16x32xbf16>, vector<64x32xf32> -> vector<64x32xf32>
    %c0_12 = arith.constant 0 : index
    %c0_13 = arith.constant 0 : index
    %22 = vector.load %arg4[%c0_12, %c0_13] : memref<16x32xbf16, #tpu.memory_space<vmem>>, vector<16x32xbf16>
    %cst_14 = arith.constant dense<0.000000e+00> : vector<64x32xf32>
    %23 = tpu.matmul %19, %22, %cst_14 {dimension_numbers = #tpu.dot_dimension_numbers<[1], [0], [0], [1], [0, 0, 1, 1], [], []>} : vector<64x16xbf16>, vector<16x32xbf16>, vector<64x32xf32> -> vector<64x32xf32>
    %c0_15 = arith.constant 0 : index
    %c0_16 = arith.constant 0 : index
    %24 = vector.load %arg6[%c0_15, %c0_16] : memref<1x32xf32, #tpu.memory_space<vmem>>, vector<1x32xf32>
    %25 = vector.broadcast %24 : vector<1x32xf32> to vector<64x32xf32>
    %26 = arith.addf %23, %25 : vector<64x32xf32>
    %27 = arith.subf %26, %21 : vector<64x32xf32>
    %28 = tpu.iota {dimensions = array<i32: 1>} : vector<64x64xi32>
    %29 = arith.sitofp %28 : vector<64x64xi32> to vector<64x64xf32>
    %cst_17 = arith.constant 0xFF800000 : f32
    %30 = vector.broadcast %cst_17 : f32 to vector<64x32xf32>
    %cst_18 = arith.constant dense<0xFF800000> : vector<64xf32>
    %31 = vector.multi_reduction <maximumf>, %18, %cst_18 [1] : vector<64x64xf32> to vector<64xf32>
    %32 = vector.shape_cast %31 : vector<64xf32> to vector<64x1xf32>
    %33 = vector.broadcast %32 : vector<64x1xf32> to vector<64x64xf32>
    %34 = arith.cmpf oge, %18, %33 : vector<64x64xf32>
    %cst_19 = arith.constant 6.400000e+01 : f32
    %35 = vector.broadcast %cst_19 : f32 to vector<64x64xf32>
    %36 = arith.select %34, %29, %35 : vector<64x64xi1>, vector<64x64xf32>
    %cst_20 = arith.constant dense<0x7F800000> : vector<64xf32>
    %37 = vector.multi_reduction <minimumf>, %36, %cst_20 [1] : vector<64x64xf32> to vector<64xf32>
    %38 = vector.shape_cast %37 : vector<64xf32> to vector<64x1xf32>
    %39 = vector.broadcast %38 : vector<64x1xf32> to vector<64x64xf32>
    %40 = arith.cmpf oeq, %29, %39 : vector<64x64xf32>
    %41 = arith.extui %40 : vector<64x64xi1> to vector<64x64xi32>
    %42 = arith.sitofp %41 : vector<64x64xi32> to vector<64x64xf32>
    %cst_21 = arith.constant dense<0.000000e+00> : vector<64x32xf32>
    %43 = tpu.matmul %42, %21, %cst_21 {dimension_numbers = #tpu.dot_dimension_numbers<[1], [0], [0], [1], [0, 0, 1, 1], [], []>} : vector<64x64xf32>, vector<64x32xf32>, vector<64x32xf32> -> vector<64x32xf32>
    %44 = arith.maximumf %30, %43 : vector<64x32xf32>
    %cst_22 = arith.constant 0xFF800000 : f32
    %45 = vector.broadcast %cst_22 : f32 to vector<64x64xf32>
    %46 = arith.select %40, %45, %18 : vector<64x64xi1>, vector<64x64xf32>
    %cst_23 = arith.constant dense<0xFF800000> : vector<64xf32>
    %47 = vector.multi_reduction <maximumf>, %46, %cst_23 [1] : vector<64x64xf32> to vector<64xf32>
    %48 = vector.shape_cast %47 : vector<64xf32> to vector<64x1xf32>
    %49 = vector.broadcast %48 : vector<64x1xf32> to vector<64x64xf32>
    %50 = arith.cmpf oge, %46, %49 : vector<64x64xf32>
    %cst_24 = arith.constant 6.400000e+01 : f32
    %51 = vector.broadcast %cst_24 : f32 to vector<64x64xf32>
    %52 = arith.select %50, %29, %51 : vector<64x64xi1>, vector<64x64xf32>
    %cst_25 = arith.constant dense<0x7F800000> : vector<64xf32>
    %53 = vector.multi_reduction <minimumf>, %52, %cst_25 [1] : vector<64x64xf32> to vector<64xf32>
    %54 = vector.shape_cast %53 : vector<64xf32> to vector<64x1xf32>
    %55 = vector.broadcast %54 : vector<64x1xf32> to vector<64x64xf32>
    %56 = arith.cmpf oeq, %29, %55 : vector<64x64xf32>
    %57 = arith.extui %56 : vector<64x64xi1> to vector<64x64xi32>
    %58 = arith.sitofp %57 : vector<64x64xi32> to vector<64x64xf32>
    %cst_26 = arith.constant dense<0.000000e+00> : vector<64x32xf32>
    %59 = tpu.matmul %58, %21, %cst_26 {dimension_numbers = #tpu.dot_dimension_numbers<[1], [0], [0], [1], [0, 0, 1, 1], [], []>} : vector<64x64xf32>, vector<64x32xf32>, vector<64x32xf32> -> vector<64x32xf32>
    %60 = arith.maximumf %44, %59 : vector<64x32xf32>
    %cst_27 = arith.constant 0xFF800000 : f32
    %61 = vector.broadcast %cst_27 : f32 to vector<64x64xf32>
    %62 = arith.select %56, %61, %46 : vector<64x64xi1>, vector<64x64xf32>
    %cst_28 = arith.constant dense<0xFF800000> : vector<64xf32>
    %63 = vector.multi_reduction <maximumf>, %62, %cst_28 [1] : vector<64x64xf32> to vector<64xf32>
    %64 = vector.shape_cast %63 : vector<64xf32> to vector<64x1xf32>
    %65 = vector.broadcast %64 : vector<64x1xf32> to vector<64x64xf32>
    %66 = arith.cmpf oge, %62, %65 : vector<64x64xf32>
    %cst_29 = arith.constant 6.400000e+01 : f32
    %67 = vector.broadcast %cst_29 : f32 to vector<64x64xf32>
    %68 = arith.select %66, %29, %67 : vector<64x64xi1>, vector<64x64xf32>
    %cst_30 = arith.constant dense<0x7F800000> : vector<64xf32>
    %69 = vector.multi_reduction <minimumf>, %68, %cst_30 [1] : vector<64x64xf32> to vector<64xf32>
    %70 = vector.shape_cast %69 : vector<64xf32> to vector<64x1xf32>
    %71 = vector.broadcast %70 : vector<64x1xf32> to vector<64x64xf32>
    %72 = arith.cmpf oeq, %29, %71 : vector<64x64xf32>
    %73 = arith.extui %72 : vector<64x64xi1> to vector<64x64xi32>
    %74 = arith.sitofp %73 : vector<64x64xi32> to vector<64x64xf32>
    %cst_31 = arith.constant dense<0.000000e+00> : vector<64x32xf32>
    %75 = tpu.matmul %74, %21, %cst_31 {dimension_numbers = #tpu.dot_dimension_numbers<[1], [0], [0], [1], [0, 0, 1, 1], [], []>} : vector<64x64xf32>, vector<64x32xf32>, vector<64x32xf32> -> vector<64x32xf32>
    %76 = arith.maximumf %60, %75 : vector<64x32xf32>
    %cst_32 = arith.constant 0xFF800000 : f32
    %77 = vector.broadcast %cst_32 : f32 to vector<64x64xf32>
    %78 = arith.select %72, %77, %62 : vector<64x64xi1>, vector<64x64xf32>
    %cst_33 = arith.constant dense<0xFF800000> : vector<64xf32>
    %79 = vector.multi_reduction <maximumf>, %78, %cst_33 [1] : vector<64x64xf32> to vector<64xf32>
    %80 = vector.shape_cast %79 : vector<64xf32> to vector<64x1xf32>
    %81 = vector.broadcast %80 : vector<64x1xf32> to vector<64x64xf32>
    %82 = arith.cmpf oge, %78, %81 : vector<64x64xf32>
    %cst_34 = arith.constant 6.400000e+01 : f32
    %83 = vector.broadcast %cst_34 : f32 to vector<64x64xf32>
    %84 = arith.select %82, %29, %83 : vector<64x64xi1>, vector<64x64xf32>
    %cst_35 = arith.constant dense<0x7F800000> : vector<64xf32>
    %85 = vector.multi_reduction <minimumf>, %84, %cst_35 [1] : vector<64x64xf32> to vector<64xf32>
    %86 = vector.shape_cast %85 : vector<64xf32> to vector<64x1xf32>
    %87 = vector.broadcast %86 : vector<64x1xf32> to vector<64x64xf32>
    %88 = arith.cmpf oeq, %29, %87 : vector<64x64xf32>
    %89 = arith.extui %88 : vector<64x64xi1> to vector<64x64xi32>
    %90 = arith.sitofp %89 : vector<64x64xi32> to vector<64x64xf32>
    %cst_36 = arith.constant dense<0.000000e+00> : vector<64x32xf32>
    %91 = tpu.matmul %90, %21, %cst_36 {dimension_numbers = #tpu.dot_dimension_numbers<[1], [0], [0], [1], [0, 0, 1, 1], [], []>} : vector<64x64xf32>, vector<64x32xf32>, vector<64x32xf32> -> vector<64x32xf32>
    %92 = arith.maximumf %76, %91 : vector<64x32xf32>
    %cst_37 = arith.constant 0xFF800000 : f32
    %93 = vector.broadcast %cst_37 : f32 to vector<64x64xf32>
    %94 = arith.select %88, %93, %78 : vector<64x64xi1>, vector<64x64xf32>
    %cst_38 = arith.constant dense<0xFF800000> : vector<64xf32>
    %95 = vector.multi_reduction <maximumf>, %94, %cst_38 [1] : vector<64x64xf32> to vector<64xf32>
    %96 = vector.shape_cast %95 : vector<64xf32> to vector<64x1xf32>
    %97 = vector.broadcast %96 : vector<64x1xf32> to vector<64x64xf32>
    %98 = arith.cmpf oge, %94, %97 : vector<64x64xf32>
    %cst_39 = arith.constant 6.400000e+01 : f32
    %99 = vector.broadcast %cst_39 : f32 to vector<64x64xf32>
    %100 = arith.select %98, %29, %99 : vector<64x64xi1>, vector<64x64xf32>
    %cst_40 = arith.constant dense<0x7F800000> : vector<64xf32>
    %101 = vector.multi_reduction <minimumf>, %100, %cst_40 [1] : vector<64x64xf32> to vector<64xf32>
    %102 = vector.shape_cast %101 : vector<64xf32> to vector<64x1xf32>
    %103 = vector.broadcast %102 : vector<64x1xf32> to vector<64x64xf32>
    %104 = arith.cmpf oeq, %29, %103 : vector<64x64xf32>
    %105 = arith.extui %104 : vector<64x64xi1> to vector<64x64xi32>
    %106 = arith.sitofp %105 : vector<64x64xi32> to vector<64x64xf32>
    %cst_41 = arith.constant dense<0.000000e+00> : vector<64x32xf32>
    %107 = tpu.matmul %106, %21, %cst_41 {dimension_numbers = #tpu.dot_dimension_numbers<[1], [0], [0], [1], [0, 0, 1, 1], [], []>} : vector<64x64xf32>, vector<64x32xf32>, vector<64x32xf32> -> vector<64x32xf32>
    %108 = arith.maximumf %92, %107 : vector<64x32xf32>
    %cst_42 = arith.constant 0xFF800000 : f32
    %109 = vector.broadcast %cst_42 : f32 to vector<64x64xf32>
    %110 = arith.select %104, %109, %94 : vector<64x64xi1>, vector<64x64xf32>
    %cst_43 = arith.constant dense<0xFF800000> : vector<64xf32>
    %111 = vector.multi_reduction <maximumf>, %110, %cst_43 [1] : vector<64x64xf32> to vector<64xf32>
    %112 = vector.shape_cast %111 : vector<64xf32> to vector<64x1xf32>
    %113 = vector.broadcast %112 : vector<64x1xf32> to vector<64x64xf32>
    %114 = arith.cmpf oge, %110, %113 : vector<64x64xf32>
    %cst_44 = arith.constant 6.400000e+01 : f32
    %115 = vector.broadcast %cst_44 : f32 to vector<64x64xf32>
    %116 = arith.select %114, %29, %115 : vector<64x64xi1>, vector<64x64xf32>
    %cst_45 = arith.constant dense<0x7F800000> : vector<64xf32>
    %117 = vector.multi_reduction <minimumf>, %116, %cst_45 [1] : vector<64x64xf32> to vector<64xf32>
    %118 = vector.shape_cast %117 : vector<64xf32> to vector<64x1xf32>
    %119 = vector.broadcast %118 : vector<64x1xf32> to vector<64x64xf32>
    %120 = arith.cmpf oeq, %29, %119 : vector<64x64xf32>
    %121 = arith.extui %120 : vector<64x64xi1> to vector<64x64xi32>
    %122 = arith.sitofp %121 : vector<64x64xi32> to vector<64x64xf32>
    %cst_46 = arith.constant dense<0.000000e+00> : vector<64x32xf32>
    %123 = tpu.matmul %122, %21, %cst_46 {dimension_numbers = #tpu.dot_dimension_numbers<[1], [0], [0], [1], [0, 0, 1, 1], [], []>} : vector<64x64xf32>, vector<64x32xf32>, vector<64x32xf32> -> vector<64x32xf32>
    %124 = arith.maximumf %108, %123 : vector<64x32xf32>
    %cst_47 = arith.constant 0xFF800000 : f32
    %125 = vector.broadcast %cst_47 : f32 to vector<64x64xf32>
    %126 = arith.select %120, %125, %110 : vector<64x64xi1>, vector<64x64xf32>
    %cst_48 = arith.constant dense<0xFF800000> : vector<64xf32>
    %127 = vector.multi_reduction <maximumf>, %126, %cst_48 [1] : vector<64x64xf32> to vector<64xf32>
    %128 = vector.shape_cast %127 : vector<64xf32> to vector<64x1xf32>
    %129 = vector.broadcast %128 : vector<64x1xf32> to vector<64x64xf32>
    %130 = arith.cmpf oge, %126, %129 : vector<64x64xf32>
    %cst_49 = arith.constant 6.400000e+01 : f32
    %131 = vector.broadcast %cst_49 : f32 to vector<64x64xf32>
    %132 = arith.select %130, %29, %131 : vector<64x64xi1>, vector<64x64xf32>
    %cst_50 = arith.constant dense<0x7F800000> : vector<64xf32>
    %133 = vector.multi_reduction <minimumf>, %132, %cst_50 [1] : vector<64x64xf32> to vector<64xf32>
    %134 = vector.shape_cast %133 : vector<64xf32> to vector<64x1xf32>
    %135 = vector.broadcast %134 : vector<64x1xf32> to vector<64x64xf32>
    %136 = arith.cmpf oeq, %29, %135 : vector<64x64xf32>
    %137 = arith.extui %136 : vector<64x64xi1> to vector<64x64xi32>
    %138 = arith.sitofp %137 : vector<64x64xi32> to vector<64x64xf32>
    %cst_51 = arith.constant dense<0.000000e+00> : vector<64x32xf32>
    %139 = tpu.matmul %138, %21, %cst_51 {dimension_numbers = #tpu.dot_dimension_numbers<[1], [0], [0], [1], [0, 0, 1, 1], [], []>} : vector<64x64xf32>, vector<64x32xf32>, vector<64x32xf32> -> vector<64x32xf32>
    %140 = arith.maximumf %124, %139 : vector<64x32xf32>
    %cst_52 = arith.constant 0xFF800000 : f32
    %141 = vector.broadcast %cst_52 : f32 to vector<64x64xf32>
    %142 = arith.select %136, %141, %126 : vector<64x64xi1>, vector<64x64xf32>
    %cst_53 = arith.constant dense<0xFF800000> : vector<64xf32>
    %143 = vector.multi_reduction <maximumf>, %142, %cst_53 [1] : vector<64x64xf32> to vector<64xf32>
    %144 = vector.shape_cast %143 : vector<64xf32> to vector<64x1xf32>
    %145 = vector.broadcast %144 : vector<64x1xf32> to vector<64x64xf32>
    %146 = arith.cmpf oge, %142, %145 : vector<64x64xf32>
    %cst_54 = arith.constant 6.400000e+01 : f32
    %147 = vector.broadcast %cst_54 : f32 to vector<64x64xf32>
    %148 = arith.select %146, %29, %147 : vector<64x64xi1>, vector<64x64xf32>
    %cst_55 = arith.constant dense<0x7F800000> : vector<64xf32>
    %149 = vector.multi_reduction <minimumf>, %148, %cst_55 [1] : vector<64x64xf32> to vector<64xf32>
    %150 = vector.shape_cast %149 : vector<64xf32> to vector<64x1xf32>
    %151 = vector.broadcast %150 : vector<64x1xf32> to vector<64x64xf32>
    %152 = arith.cmpf oeq, %29, %151 : vector<64x64xf32>
    %153 = arith.extui %152 : vector<64x64xi1> to vector<64x64xi32>
    %154 = arith.sitofp %153 : vector<64x64xi32> to vector<64x64xf32>
    %cst_56 = arith.constant dense<0.000000e+00> : vector<64x32xf32>
    %155 = tpu.matmul %154, %21, %cst_56 {dimension_numbers = #tpu.dot_dimension_numbers<[1], [0], [0], [1], [0, 0, 1, 1], [], []>} : vector<64x64xf32>, vector<64x32xf32>, vector<64x32xf32> -> vector<64x32xf32>
    %156 = arith.maximumf %140, %155 : vector<64x32xf32>
    %cst_57 = arith.constant 0xFF800000 : f32
    %157 = vector.broadcast %cst_57 : f32 to vector<64x64xf32>
    %158 = arith.select %152, %157, %142 : vector<64x64xi1>, vector<64x64xf32>
    %cst_58 = arith.constant dense<0xFF800000> : vector<64xf32>
    %159 = vector.multi_reduction <maximumf>, %158, %cst_58 [1] : vector<64x64xf32> to vector<64xf32>
    %160 = vector.shape_cast %159 : vector<64xf32> to vector<64x1xf32>
    %161 = vector.broadcast %160 : vector<64x1xf32> to vector<64x64xf32>
    %162 = arith.cmpf oge, %158, %161 : vector<64x64xf32>
    %cst_59 = arith.constant 6.400000e+01 : f32
    %163 = vector.broadcast %cst_59 : f32 to vector<64x64xf32>
    %164 = arith.select %162, %29, %163 : vector<64x64xi1>, vector<64x64xf32>
    %cst_60 = arith.constant dense<0x7F800000> : vector<64xf32>
    %165 = vector.multi_reduction <minimumf>, %164, %cst_60 [1] : vector<64x64xf32> to vector<64xf32>
    %166 = vector.shape_cast %165 : vector<64xf32> to vector<64x1xf32>
    %167 = vector.broadcast %166 : vector<64x1xf32> to vector<64x64xf32>
    %168 = arith.cmpf oeq, %29, %167 : vector<64x64xf32>
    %169 = arith.extui %168 : vector<64x64xi1> to vector<64x64xi32>
    %170 = arith.sitofp %169 : vector<64x64xi32> to vector<64x64xf32>
    %cst_61 = arith.constant dense<0.000000e+00> : vector<64x32xf32>
    %171 = tpu.matmul %170, %21, %cst_61 {dimension_numbers = #tpu.dot_dimension_numbers<[1], [0], [0], [1], [0, 0, 1, 1], [], []>} : vector<64x64xf32>, vector<64x32xf32>, vector<64x32xf32> -> vector<64x32xf32>
    %172 = arith.maximumf %156, %171 : vector<64x32xf32>
    %173 = arith.addf %27, %172 : vector<64x32xf32>
    %cst_62 = arith.constant 0.000000e+00 : f32
    %174 = vector.broadcast %cst_62 : f32 to vector<64x32xf32>
    %175 = arith.maximumf %173, %174 : vector<64x32xf32>
    %176 = arith.truncf %175 : vector<64x32xf32> to vector<64x32xbf16>
    %c0_63 = arith.constant 0 : index
    %c0_64 = arith.constant 0 : index
    %177 = vector.load %arg7[%c0_63, %c0_64] : memref<32x16xbf16, #tpu.memory_space<vmem>>, vector<32x16xbf16>
    %cst_65 = arith.constant dense<0.000000e+00> : vector<64x16xf32>
    %178 = tpu.matmul %176, %177, %cst_65 {dimension_numbers = #tpu.dot_dimension_numbers<[1], [0], [0], [1], [0, 0, 1, 1], [], []>} : vector<64x32xbf16>, vector<32x16xbf16>, vector<64x16xf32> -> vector<64x16xf32>
    %c0_66 = arith.constant 0 : index
    %c0_67 = arith.constant 0 : index
    %179 = vector.load %arg8[%c0_66, %c0_67] : memref<1x16xf32, #tpu.memory_space<vmem>>, vector<1x16xf32>
    %180 = vector.broadcast %179 : vector<1x16xf32> to vector<64x16xf32>
    %181 = arith.addf %178, %180 : vector<64x16xf32>
    %182 = arith.addf %181, %2 : vector<64x16xf32>
    %183 = tpu.transpose %182, [1, 0] : vector<64x16xf32> -> vector<16x64xf32>
    %c0_68 = arith.constant 0 : index
    %c0_69 = arith.constant 0 : index
    %c0_70 = arith.constant 0 : index
    %184 = vector.load %arg9[%c0_68, %c0_69, %c0_70] : memref<1x16x64xf32, #tpu.memory_space<vmem>>, vector<1x16x64xf32>
    %185 = vector.shape_cast %184 : vector<1x16x64xf32> to vector<16x64xf32>
    %186 = vector.shape_cast %183 : vector<16x64xf32> to vector<1x16x64xf32>
    tpu.vector_store %arg9[%c0_68, %c0_69, %c0_70], %186 {strides = array<i32>} : memref<1x16x64xf32, #tpu.memory_space<vmem>>, vector<1x16x64xf32>,
    return
  }
  func.func @transform_0(%arg0: i32) -> (i32, i32, i32) {
    %c0_i32 = arith.constant 0 : i32
    %c0_i32_0 = arith.constant 0 : i32
    %c0_i32_1 = arith.constant 0 : i32
    return %arg0, %c0_i32, %c0_i32_0 : i32, i32, i32
  }
  func.func @transform_1(%arg0: i32) -> (i32, i32) {
    %c0_i32 = arith.constant 0 : i32
    %c0_i32_0 = arith.constant 0 : i32
    %c0_i32_1 = arith.constant 0 : i32
    return %c0_i32, %c0_i32_0 : i32, i32
  }
  func.func @transform_2(%arg0: i32) -> (i32, i32) {
    %c0_i32 = arith.constant 0 : i32
    %c0_i32_0 = arith.constant 0 : i32
    %c0_i32_1 = arith.constant 0 : i32
    return %c0_i32, %c0_i32_0 : i32, i32
  }
  func.func @transform_3(%arg0: i32) -> (i32, i32) {
    %c0_i32 = arith.constant 0 : i32
    %c0_i32_0 = arith.constant 0 : i32
    %c0_i32_1 = arith.constant 0 : i32
    return %c0_i32, %c0_i32_0 : i32, i32
  }
  func.func @transform_4(%arg0: i32) -> (i32, i32) {
    %c0_i32 = arith.constant 0 : i32
    %c0_i32_0 = arith.constant 0 : i32
    %c0_i32_1 = arith.constant 0 : i32
    return %c0_i32, %c0_i32_0 : i32, i32
  }
  func.func @transform_5(%arg0: i32) -> (i32, i32) {
    %c0_i32 = arith.constant 0 : i32
    %c0_i32_0 = arith.constant 0 : i32
    %c0_i32_1 = arith.constant 0 : i32
    return %c0_i32, %c0_i32_0 : i32, i32
  }
  func.func @transform_6(%arg0: i32) -> (i32, i32) {
    %c0_i32 = arith.constant 0 : i32
    %c0_i32_0 = arith.constant 0 : i32
    %c0_i32_1 = arith.constant 0 : i32
    return %c0_i32, %c0_i32_0 : i32, i32
  }
  func.func @transform_7(%arg0: i32) -> (i32, i32) {
    %c0_i32 = arith.constant 0 : i32
    %c0_i32_0 = arith.constant 0 : i32
    %c0_i32_1 = arith.constant 0 : i32
    return %c0_i32, %c0_i32_0 : i32, i32
  }
  func.func @transform_8(%arg0: i32) -> (i32, i32, i32) {
    %c0_i32 = arith.constant 0 : i32
    %c0_i32_0 = arith.constant 0 : i32
    %c0_i32_1 = arith.constant 0 : i32
    return %arg0, %c0_i32, %c0_i32_0 : i32, i32, i32
  }
}

</mosaic_0001>

<bundles_post_ra>
// kernel: tpu_custom_call.1
= control target key start
LH: loop header
LB: loop body
LE: loop exit
PB: predicated region body
PF: predicated region fallthrough
CT: control target
= control target key end

     0   :  { %13 = vsyncpa [#allocation3], 0  ;;  %s5336_s0 = inlined_call_operand.hbm [shape: f32[2,16,64], index: 0, kind: input, shape index: {}]   ;;  %s5337_s1 = inlined_call_operand.vmem [shape: bf16[16,16], index: 1, kind: input, shape index: {}]   ;;  %s5338_s2 = inlined_call_operand.vmem [shape: f32[1,16], index: 2, kind: input, shape index: {}]   ;;  %s5339_s3 = inlined_call_operand.vmem [shape: bf16[16,32], index: 3, kind: input, shape index: {}]   ;;  %s5340_s4 = inlined_call_operand.vmem [shape: bf16[16,32], index: 4, kind: input, shape index: {}]   ;;  %s5341_s5 = inlined_call_operand.vmem [shape: f32[1,32], index: 5, kind: input, shape index: {}]   ;;  %s5342_s6 = inlined_call_operand.vmem [shape: bf16[32,16], index: 6, kind: input, shape index: {}]   ;;  %s5343_s7 = inlined_call_operand.vmem [shape: f32[1,16], index: 7, kind: input, shape index: {}]   ;;  %s5344_s8 = inlined_call_operand.hbm [shape: f32[2,16,64], index: 8, kind: output, shape index: {}]  }
   0x1   :  { %15 = vsyncpa [#allocation3 + $0x1], 0 }
   0x2   :  { %16 = vsyncpa [#allocation4], 0 }
   0x3   :  { %18 = vsyncpa [#allocation4 + $0x1], 0  ;;  %s3998_s27 = smov 0   ;;  %s4000_s28 = smov 0  }
   0x4   :  { %s4002_s29 = smov 0   ;;  %s4004_s30 = smov 0  }
   0x5 LB: > { %s4019_s9 = sadd.s32 4294967295, %s3944_s30   ;;  %s3105_s10 = sadd.s32 4294967294, %s3944_s30   ;;  %s3944_s30 = sphi %s4004_s30, %s5427_s30   ;;  %s3940_s29 = sphi %s4002_s29, %s5426_s29   ;;  %s3936_s28 = sphi %s4000_s28, %s5425_s28   ;;  %s3932_s27 = sphi %s3998_s27, %s5424_s27  }
   0x6   : > { %s4023_s11 = sadd.s32 1, %s3944_s30   ;;  %s31_s12 = sadd.s32 1, %s3940_s29 }
   0x7   : > { %s28_s13 = ssub.s32 %s3944_s30, %s4023_s11  ;;  %p38_p0 = scmp.ne.s32.totalorder %s3940_s29, %s3936_s28 }
   0x8   : > { %p29_p1 = scmp.eq.s32.totalorder %s28_s13, 0  ;;  %p39_p2 = scmp.eq.s32.totalorder %s3944_s30, 0 }
   0x9   : > { %p44_p3 = scmp.ne.s32.totalorder %s3936_s28, %s3932_s27  ;;  %p45_p4 = scmp.eq.s32.totalorder %s4019_s9, 0 }
   0xa   : > { %s4035_s14 = scalar_select %p29_p1, %s3940_s29, %s31_s12  }
   0xb   : > { %p4037_p5 = por %p39_p2, %p38_p0  ;;  %p4041_p6 = por %p45_p4, %p44_p3 }
   0xc   : > { %5359 = sst [smem:[#allocation8_spill]] %s4035_s14  ;;  %p215_p7 = scmp.eq.s32.totalorder %s4019_s9, 1 }
   0xd   : > { %s5361_s16 = scalar_select %p4041_p6, 1, 0 }
   0xe   : > { %p221_p8 = scmp.eq.s32.totalorder %s3105_s10, 1  ;;  %p3792_p10 = scmp.lt.s32.totalorder %s3944_s30, 2 }
   0xf   : > { %p4048_p11 = por %p215_p7, %p38_p0  ;;  %s262_s19 = sand.u32 1, %s3940_s29  }
  0x10   : > { %p4052_p12 = por %p221_p8, %p44_p3  ;;  %s3291_s20 = sshll.u32 %s3944_s30, 8 }
  0x11   : > { %s5362_s17 = scalar_select %p4048_p11, 1, 0 }
  0x12   : > { %s5363_s18 = scalar_select %p4052_p12, 1, 0 }
  0x13   : > { %s3108_s21 = sshll.u32 %s262_s19, 4  ;;  %s4061_s24 = scalar_lea.hbm %s5336_s0, %s3291_s20 }
  0x14   : > { %s266_s25 = scalar_lea.vmem [#allocation2], %s3108_s21  ;;  %p4065_p13 = pnand %p3792_p10, %p4037_p5 }
  0x15   : > { %s273_s26 = sshll.u32 %s266_s25, 4  ;;  %s4071_s12 = scalar_lea.sflag [#allocation3], %s262_s19  ;;  %s4069_s26 = int_to_ptr.vmem [resolvable:$true] %s273_s26 }
  0x16   : > { %s3852_s13 = scalar_lea.hbm %s4061_s24, 256  ;;  %p3854_p1 = pneg %p4065_p13 }
  0x17   : > { %p3853_p0 = scmp.ne.s32.totalorder %s4061_s24, %s3852_s13  ;;  %s3857_s21 = scalar_lea.hbm %s5336_s0, 512 }
  0x18   : > { %p3858_p4 = scmp.lt.s32.totalorder %s4061_s24, %s5336_s0  ;;  %p3859_p5 = scmp.lt.s32.totalorder %s3857_s21, %s3852_s13 }
  0x19   : > { %p3855_p2 = pnand %p3854_p1, %p3853_p0 }
  0x1a   : > { %p3860_p7 = por %p3859_p5, %p3858_p4 }
  0x1b   : > { %p3856_p3 = pneg %p3855_p2 }
  0x1d   : > { %p3861_p8 = pnand %p3860_p7, %p3856_p3 }
  0x1f   : > { %3864 = shalt.err (!%p3861_p8)
}
  0x20   : > { %s3865_s19 = scalar_lea.vmem %s4069_s26, 256  ;;  %s3946_s25 = smov [#allocation2]  }
  0x21   : > { %p3866_p10 = scmp.ne.s32.totalorder %s4069_s26, %s3865_s19  ;;  %s3870_s14 = sshll.u32 %s3946_s25, 4  ;;  %s3871_s14 = int_to_ptr.vmem [resolvable:$false] %s3870_s14 }
  0x22   : > { %s3872_s20 = scalar_lea.vmem %s3871_s14, 512  ;;  %p3873_p2 = scmp.lt.s32.totalorder %s4069_s26, %s3871_s14 }
  0x23   : > { %p3868_p9 = pnand %p3866_p10, %p3854_p1  ;;  %p3874_p12 = scmp.lt.s32.totalorder %s3872_s20, %s3865_s19 }
  0x25   : > { %p3869_p0 = pneg %p3868_p9  ;;  %p3875_p11 = por %p3874_p12, %p3873_p2 }
  0x27   : > { %p3876_p6 = pnand %p3875_p11, %p3869_p0 }
  0x29   : > { %3879 = shalt.err (!%p3876_p6)
}
  0x2a   : > { %s3947_s13 = smov 128   ;;  %s3948_s22 = smov 8  }
  0x2b   : > { %3787 = dma.hbm_to_vmem [thread:$0]  (!%p4065_p13), %s4061_s24, 256, %s4069_s26, %s4071_s12, %s3947_s13, %s3947_s13, %s3948_s22  }
  0x2c   : > { %p3111_p9 = scmp.ge.s32.totalorder %s3944_s30, 1  ;;  %p281_p1 = scmp.lt.s32.totalorder %s3944_s30, 3 }
  0x2e   : > { %p282_p3 = pnand %p3111_p9, %p281_p1 }
  0x30   : > { %285 = sbr.rel (%p282_p3) target bundleno = 3897 (0xf39), region = 52 }
  0x35   : > { %s4095_s14 = sand.u32 1, %s3936_s28   ;;  %p5365_p6 = scmp.ne.s32.totalorder %s5361_s16, 0 }
  0x36   : > { %s3112_s21 = sshll.u32 %s4095_s14, 4  ;;  %s288_s15 = scalar_lea.sflag [#allocation3], %s4095_s14 }
  0x37   : > { %s291_s23 = scalar_lea.vmem [#allocation2], %s3112_s21 }
  0x38   : > { %3923 = dma.done.wait (%p5365_p6), %s288_s15, 256  }
  0x39   : > { %3925 = vsyncadd (%p5365_p6), %s288_s15, 4294967040  ;;  %v325_v0 = vld [vmem:[%s291_s23] sm:$0xff]  ;;  %v326_v1 = vld [vmem:[%s291_s23 + $0x8] sm:$0xff]  ;;  %vm378_vm0 = vcmask 130048   ;;  %vm773_vm1 = vcmask 523264   ;;  %s323_s12 = scalar_lea.vmem [#allocation5], %s3112_s21 }
  0x3a   : > { %327 = vxpose.xlu0.b32.start [1/2] (short) (narrow) %v325_v0, 64  ;;  %v3831_v2 = vld [vmem:[%s5337_s1] sm:$0xff]   ;;  %s3032_s19 = sshll.u32 %s323_s12, 4  ;;  %s3292_s25 = sshll.u32 %s4019_s9, 8  ;;  %s5286_s19 = int_to_ptr.vmem [resolvable:$true] %s3032_s19 }
  0x3b   : > { %3466 = vmatprep.subr.bf16.mxu0 %v3831_v2  ;;  %v3832_v15 = vld [vmem:[%s5340_s4] sm:$0xff]   ;;  %s5292_s22 = scalar_lea.hbm %s5344_s8, %s3292_s25  ;;  %s3019_s15 = scalar_lea.sflag [#allocation4], %s4095_s14 }
  0x3c   : > { %3467 = vmatpush3.bf16.msra.mxu0 %v3831_v2  ;;  %v3833_v16 = vld [vmem:[%s5339_s3] sm:$0xff]   ;;  %s3880_s21 = scalar_lea.vmem %s5286_s19, 256  ;;  %p5420_p12 = scmp.ne.s32.totalorder %s5362_s17, 0 }
  0x3d   : > { %3492 = vmatprep.subr.bf16.mxu0 %v3832_v15  ;;  %v3114_v20 = vld [vmem:[%s5338_s2] ss:$0 sm:$0xff]  ;;  %p3881_p11 = scmp.ne.s32.totalorder %s5286_s19, %s3880_s21  ;;  %s3950_s9 = smov [#allocation5]  }
  0x3e   : > { %328 = vxpose.xlu0.b32.end [2/2] (short) (narrow) %v326_v1, 64  ;;  %s3884_s23 = sshll.u32 %s3950_s9, 4  ;;  %s3885_s23 = int_to_ptr.vmem [resolvable:$false] %s3884_s23 }
  0x3f   : > { %p3882_p13 = pnand %p3881_p11, %p5420_p12  ;;  %s3886_s24 = scalar_lea.vmem %s3885_s23, 512 }
  0x40   : > { %p3887_p5 = scmp.lt.s32.totalorder %s5286_s19, %s3885_s23  ;;  %p3888_p7 = scmp.lt.s32.totalorder %s3886_s24, %s3880_s21 }
  0x41   : > { %p3883_p4 = pneg %p3882_p13 }
  0x42   : > { %p3889_p8 = por %p3888_p7, %p3887_p5 }
  0x44   : > { %p3890_p10 = pnand %p3889_p8, %p3883_p4 }
  0xb6   : > { %v4108_v3 = vpop.trf.xlu0 }
  0xb7   : > { %5366 = vst [vmem:[#allocation9_spill] sm:$0xff] %v4108_v3 }
  0xba   : > { %v4110_v4 = vpop.trf.xlu0 }
  0xbb   : > { %5367 = vst [vmem:[#allocation10_spill] sm:$0xff] %v4110_v4  ;;  %v359_v5 = vpack.c.bf16 %v4110_v4, %v4108_v3 }
  0xbd   : > { %3468 = vmatprep.mubr.msk.bf16.mxu0 %vm378_vm0, %v359_v5 }
  0xbe   : > { %v4115_v6 = vpop.trf.xlu0 }
  0xbf   : > { %5368 = vst [vmem:[#allocation11_spill] sm:$0xff] %v4115_v6 }
  0xc2   : > { %v4117_v7 = vpop.trf.xlu0 }
  0xc3   : > { %5369 = vst [vmem:[#allocation12_spill] sm:$0xff] %v4117_v7  ;;  %v360_v8 = vpack.c.bf16 %v4117_v7, %v4115_v6 }
  0xc5   : > { %3469 = vmatmul.mubr.msk.bf16.vlgmr.msra.gmra.mxu0 %vm378_vm0, %v360_v8 }
  0xc6   : > { %v4122_v9 = vpop.trf.xlu0  ;;  %3493 = vmatpush3.bf16.msra.mxu0 %v3832_v15 }
  0xc7   : > { %5370 = vst [vmem:[#allocation13_spill] sm:$0xff] %v4122_v9  ;;  %3502 = vmatprep.subr.bf16.mxu0 %v3833_v16 }
  0xca   : > { %v4124_v10 = vpop.trf.xlu0 }
  0xcb   : > { %5371 = vst [vmem:[#allocation14_spill] sm:$0xff] %v4124_v10  ;;  %v361_v11 = vpack.c.bf16 %v4124_v10, %v4122_v9 }
  0xcd   : > { %3472 = vmatprep.mubr.msk.bf16.mxu0 %vm378_vm0, %v361_v11 }
  0xce   : > { %v4129_v12 = vpop.trf.xlu0 }
  0xcf   : > { %5372 = vst [vmem:[#allocation15_spill] sm:$0xff] %v4129_v12 }
  0xd2   : > { %v4131_v13 = vpop.trf.xlu0 }
  0xd3   : > { %5373 = vst [vmem:[#allocation16_spill] sm:$0xff] %v4131_v13  ;;  %v362_v14 = vpack.c.bf16 %v4131_v13, %v4129_v12 }
  0xd5   : > { %3473 = vmatmul.mubr.msk.bf16.gmra.mxu0 %vm378_vm0, %v362_v14 }
 0x185   : > { %v3470_v17 = vpop.f32.mrf.mxu0 }
 0x186   : > { %v4151_v25 = vadd.f32 %v3470_v17, %v3114_v20 }
 0x187   : > { %v425_v18 = vpop.f32.mrf.mxu0 }
 0x188   : > { %v4147_v23 = vadd.f32 %v3114_v20, %v425_v18  ;;  %v458_v46 = vmul.f32 %v4151_v25, %v4151_v25 }
 0x189   : > { %v3471_v19 = vpop.f32.mrf.mxu0 }
 0x18a   : > { %v4145_v21 = vadd.f32 %v3471_v19, %v3114_v20  ;;  %v470_v47 = vsel %vm378_vm0, %v458_v46, 0.0  ;;  %v456_v50 = vmul.f32 %v4147_v23, %v4147_v23 }
 0x18b   : > { %v428_v22 = vpop.f32.mrf.mxu0 }
 0x18c   : > { %v4149_v24 = vadd.f32 %v3114_v20, %v428_v22  ;;  %v594_v27 = vpack.c.bf16 %v4145_v21, %v4151_v25  ;;  %v459_v48 = vmul.f32 %v4145_v21, %v4145_v21  ;;  %v464_v51 = vsel %vm378_vm0, %v456_v50, 0.0 }
 0x18e   : > { %v593_v26 = vpack.c.bf16 %v4149_v24, %v4147_v23  ;;  %v473_v49 = vsel %vm378_vm0, %v459_v48, 0.0  ;;  %v457_v52 = vmul.f32 %v4149_v24, %v4149_v24 }
 0x190   : > { %3494 = vmatprep.mubr.msk.bf16.mxu0 %vm378_vm0, %v593_v26  ;;  %v467_v53 = vsel %vm378_vm0, %v457_v52, 0.0 }
 0x191   : > { %3495 = vmatmul.mubr.msk.bf16.vlgmr.msra.gmra.mxu0 %vm378_vm0, %v594_v27 }
 0x192   : > { %3503 = vmatpush3.bf16.msra.mxu0 %v3833_v16 }
 0x195   : > { %v3474_v28 = vpop.f32.mrf.mxu0 }
 0x196   : > { %v450_v29 = vadd.f32 %v3474_v28, %v3114_v20 }
 0x197   : > { %v441_v30 = vpop.f32.mrf.mxu0 }
 0x198   : > { %v4159_v31 = vadd.f32 %v3114_v20, %v441_v30  ;;  %v462_v32 = vmul.f32 %v450_v29, %v450_v29 }
 0x199   : > { %v3475_v33 = vpop.f32.mrf.mxu0 }
 0x19a   : > { %v453_v34 = vadd.f32 %v3475_v33, %v3114_v20  ;;  %v482_v35 = vsel %vm378_vm0, %v462_v32, 0.0  ;;  %v460_v36 = vmul.f32 %v4159_v31, %v4159_v31 }
 0x19b   : > { %483 = vadd.xlane.f32.xlu1 %v482_v35  ;;  %v444_v37 = vpop.f32.mrf.mxu0 }
 0x19c   : > { %v445_v38 = vadd.f32 %v3114_v20, %v444_v37  ;;  %v476_v39 = vsel %vm378_vm0, %v460_v36, 0.0  ;;  %v463_v40 = vmul.f32 %v453_v34, %v453_v34  ;;  %v596_v44 = vpack.c.bf16 %v453_v34, %v450_v29 }
 0x19d   : > { %477 = vadd.xlane.f32.xlu0 %v476_v39 }
 0x19e   : > { %v595_v41 = vpack.c.bf16 %v445_v38, %v4159_v31  ;;  %v485_v42 = vsel %vm378_vm0, %v463_v40, 0.0  ;;  %v461_v43 = vmul.f32 %v445_v38, %v445_v38 }
 0x19f   : > { %486 = vadd.xlane.f32.xlu1 %v485_v42 }
 0x1a0   : > { %3498 = vmatprep.mubr.msk.bf16.mxu0 %vm378_vm0, %v595_v41  ;;  %v479_v45 = vsel %vm378_vm0, %v461_v43, 0.0 }
 0x1a1   : > { %3499 = vmatmul.mubr.msk.bf16.gmra.mxu0 %vm378_vm0, %v596_v44 }
 0x1a2   : > { %3504 = vmatprep.mubr.msk.bf16.mxu0 %vm378_vm0, %v593_v26 }
 0x1a3   : > { %480 = vadd.xlane.f32.xlu1 %v479_v45 }
 0x1a7   : > { %471 = vadd.xlane.f32.xlu1 %v470_v47 }
 0x1a9   : > { %3505 = vmatmul.mubr.msk.bf16.vlgmr.msra.gmra.mxu0 %vm378_vm0, %v594_v27 }
 0x1aa   : > { %3508 = vmatprep.mubr.msk.bf16.mxu0 %vm378_vm0, %v595_v41 }
 0x1ab   : > { %474 = vadd.xlane.f32.xlu1 %v473_v49 }
 0x1af   : > { %465 = vadd.xlane.f32.xlu1 %v464_v51 }
 0x1b1   : > { %3509 = vmatmul.mubr.msk.bf16.gmra.mxu0 %vm378_vm0, %v596_v44 }
 0x1b3   : > { %468 = vadd.xlane.f32.xlu1 %v467_v53 }
 0x224   : > { %v484_v54 = vpop.xlane.xlu1 %483 }
 0x225   : > { %v494_v55 = vmax.f32 %v484_v54, 1e-24 }
 0x226   : > { %v478_v56 = vpop.xlane.xlu0 %477 }
 0x227   : > { %v492_v57 = vmax.f32 %v478_v56, 1e-24  ;;  %3836 = vrsqrt.f32 %v494_v55 }
 0x228   : > { %v487_v58 = vpop.xlane.xlu1 %486 }
 0x229   : > { %v495_v59 = vmax.f32 %v487_v58, 1e-24 }
 0x22b   : > { %3838 = vrsqrt.f32 %v495_v59 }
 0x22c   : > { %3840 = vrsqrt.f32 %v492_v57  ;;  %v481_v60 = vpop.xlane.xlu1 %480 }
 0x22d   : > { %v493_v61 = vmax.f32 %v481_v60, 1e-24 }
 0x22f   : > { %3842 = vrsqrt.f32 %v493_v61 }
 0x230   : > { %v472_v62 = vpop.xlane.xlu1 %471 }
 0x231   : > { %v490_v63 = vmax.f32 %v472_v62, 1e-24  ;;  %v770_v62 = vlaneseq }
 0x233   : > { %3844 = vrsqrt.f32 %v490_v63  ;;  %v771_v63 = vand.u32 127, %v770_v62 }
 0x234   : > { %v475_v0 = vpop.xlane.xlu1 %474  ;;  %v3837_v2 = vpop.eup %3836 }
 0x235   : > { %v491_v1 = vmax.f32 %v475_v0, 1e-24  ;;  %v510_v15 = vmul.f32 %v3837_v2, %v450_v29  ;;  %v4285_v0 = vcvt.s32.f32 %v771_v63 }
 0x237   : > { %3846 = vrsqrt.f32 %v491_v1 }
 0x238   : > { %v3839_v5 = vpop.eup %3838  ;;  %v466_v8 = vpop.xlane.xlu1 %465 }
 0x239   : > { %v3841_v11 = vpop.eup %3840  ;;  %v488_v14 = vmax.f32 %v466_v8, 1e-24  ;;  %v511_v16 = vmul.f32 %v3839_v5, %v453_v34 }
 0x23a   : > { %v508_v20 = vmul.f32 %v3841_v11, %v4159_v31 }
 0x23b   : > { %v515_v17 = vpack.c.bf16 %v511_v16, %v510_v15  ;;  %3848 = vrsqrt.f32 %v488_v14 }
 0x23c   : > { %v3843_v18 = vpop.eup %3842  ;;  %v469_v19 = vpop.xlane.xlu1 %468 }
 0x23d   : > { %v489_v22 = vmax.f32 %v469_v19, 1e-24  ;;  %3776 = vmatprep.subr.msk.bf16.mxu1 %vm378_vm0, %v515_v17  ;;  %v526_v26 = vsel %vm378_vm0, %v515_v17, 0  ;;  %v509_v27 = vmul.f32 %v3843_v18, %v445_v38 }
 0x23e   : > { %3477 = vmatpush3.bf16.xpose.msra.mxu1 %v526_v26 }
 0x23f   : > { %3850 = vrsqrt.f32 %v489_v22  ;;  %v514_v28 = vpack.c.bf16 %v509_v27, %v508_v20 }
 0x240   : > { %v3845_v30 = vpop.eup %3844 }
 0x241   : > { %3777 = vmatprep.subr.msk.bf16.mxu1 %vm378_vm0, %v514_v28  ;;  %v523_v32 = vsel %vm378_vm0, %v514_v28, 0  ;;  %v506_v33 = vmul.f32 %v3845_v30, %v4151_v25 }
 0x244   : > { %v3847_v29 = vpop.eup %3846 }
 0x245   : > { %v507_v31 = vmul.f32 %v3847_v29, %v4145_v21 }
 0x246   : > { %3479 = vmatpush3.bf16.xpose.msra.mxu1 %v523_v32 }
 0x247   : > { %v513_v34 = vpack.c.bf16 %v507_v31, %v506_v33 }
 0x248   : > { %v3849_v35 = vpop.eup %3848 }
 0x249   : > { %3778 = vmatprep.subr.msk.bf16.mxu1 %vm378_vm0, %v513_v34  ;;  %v520_v37 = vsel %vm378_vm0, %v513_v34, 0  ;;  %v504_v38 = vmul.f32 %v3849_v35, %v4147_v23 }
 0x24c   : > { %v3851_v36 = vpop.eup %3850 }
 0x24d   : > { %v505_v39 = vmul.f32 %v3851_v36, %v4149_v24 }
 0x24e   : > { %3481 = vmatpush3.bf16.xpose.msra.mxu1 %v520_v37 }
 0x24f   : > { %v512_v40 = vpack.c.bf16 %v505_v39, %v504_v38  ;;  %v3949_v39 = vmov 0.0  }
 0x251   : > { %3779 = vmatprep.subr.msk.bf16.mxu1 %vm378_vm0, %v512_v40  ;;  %3484 = vmatprep.mubr.msk.bf16.mxu1 %vm378_vm0, %v512_v40  ;;  %v4199_v25 = vpop.f32.mrf.mxu0  ;;  %v517_v21 = vsel %vm378_vm0, %v512_v40, 0 }
 0x253   : > { %v4202_v41 = vpop.f32.mrf.mxu0 }
 0x255   : > { %v4204_v42 = vpop.f32.mrf.mxu0 }
 0x256   : > { %3483 = vmatpush3.bf16.xpose.msra.mxu1 %v517_v21 }
 0x257   : > { %v4208_v23 = vpop.f32.mrf.mxu0 }
 0x25d   : > { %3485 = vmatmul.mubr.msk.bf16.vlgmr.msra.gmra.mxu1 %vm378_vm0, %v513_v34 }
 0x25e   : > { %3488 = vmatprep.mubr.msk.bf16.mxu1 %vm378_vm0, %v514_v28 }
 0x261   : > { %v4210_v24 = vpop.f32.mrf.mxu0 }
 0x262   : > { %5374 = vst [vmem:[#allocation17_spill] sm:$0xff] %v4210_v24 }
 0x263   : > { %v4212_v43 = vpop.f32.mrf.mxu0 }
 0x264   : > { %5375 = vst [vmem:[#allocation18_spill] sm:$0xff] %v4212_v43 }
 0x265   : > { %3489 = vmatmul.mubr.msk.bf16.gmra.mxu1 %vm378_vm0, %v515_v17  ;;  %v4215_v44 = vpop.f32.mrf.mxu0 }
 0x266   : > { %5376 = vst [vmem:[#allocation19_spill] sm:$0xff] %v4215_v44  ;;  %3512 = vmatprep.subr.mxu1 %v4215_v44  ;;  %3540 = vmatprep.subr.mxu0 %v4215_v44 }
 0x267   : > { %3513 = vmatpush3.msra.mxu1 %v4215_v44  ;;  %3541 = vmatpush3.msra.mxu0 %v4215_v44  ;;  %v4223_v45 = vpop.f32.mrf.mxu0 }
 0x268   : > { %3514 = vmatprep.subr.mxu1 %v4210_v24  ;;  %3542 = vmatprep.subr.mxu0 %v4210_v24  ;;  %5377 = vst [vmem:[#allocation20_spill] sm:$0xff] %v4223_v45 }
 0x269   : > { %3515 = vmatpush3.msra.mxu1 %v4210_v24  ;;  %3543 = vmatpush3.msra.mxu0 %v4210_v24 }
 0x26a   : > { %3516 = vmatprep.subr.mxu1 %v4223_v45  ;;  %3544 = vmatprep.subr.mxu0 %v4223_v45 }
 0x26b   : > { %3517 = vmatpush3.msra.mxu1 %v4223_v45  ;;  %3545 = vmatpush3.msra.mxu0 %v4223_v45 }
 0x26c   : > { %3518 = vmatprep.subr.mxu1 %v4212_v43  ;;  %3546 = vmatprep.subr.mxu0 %v4212_v43 }
 0x26d   : > { %3519 = vmatpush3.msra.mxu1 %v4212_v43  ;;  %3547 = vmatpush3.msra.mxu0 %v4212_v43 }
 0x26e   : > { %3520 = vmatprep.subr.mxu1 %v4204_v42  ;;  %3548 = vmatprep.subr.mxu0 %v4204_v42 }
 0x26f   : > { %3521 = vmatpush3.msra.mxu1 %v4204_v42  ;;  %3549 = vmatpush3.msra.mxu0 %v4204_v42 }
 0x270   : > { %3522 = vmatprep.subr.mxu1 %v4199_v25  ;;  %3550 = vmatprep.subr.mxu0 %v4199_v25 }
 0x271   : > { %3523 = vmatpush3.msra.mxu1 %v4199_v25  ;;  %3551 = vmatpush3.msra.mxu0 %v4199_v25 }
 0x272   : > { %3524 = vmatprep.subr.mxu1 %v4208_v23  ;;  %3552 = vmatprep.subr.mxu0 %v4208_v23 }
 0x273   : > { %3525 = vmatpush3.msra.mxu1 %v4208_v23  ;;  %3553 = vmatpush3.msra.mxu0 %v4208_v23 }
 0x274   : > { %3526 = vmatprep.subr.mxu1 %v4202_v41  ;;  %3554 = vmatprep.subr.mxu0 %v4202_v41 }
 0x275   : > { %3527 = vmatpush3.msra.mxu1 %v4202_v41  ;;  %3555 = vmatpush3.msra.mxu0 %v4202_v41 }
 0x276   : > { %3568 = vmatprep.subr.mxu1 %v4215_v44  ;;  %3596 = vmatprep.subr.mxu0 %v4215_v44 }
 0x31d   : > { %v4253_v46 = vpop.f32.mrf.mxu1 }
 0x31e   : > { %v780_v47 = vsel %vm773_vm1, %v4253_v46, -inf }
 0x31f   : > { %781 = vmax.xlane.f32.xlu1 %v780_v47  ;;  %v4257_v48 = vpop.f32.mrf.mxu1 }
 0x320   : > { %v774_v50 = vsel %vm773_vm1, %v4257_v48, -inf }
 0x321   : > { %v4259_v49 = vpop.f32.mrf.mxu1 }
 0x322   : > { %v783_v52 = vsel %vm773_vm1, %v4259_v49, -inf }
 0x323   : > { %775 = vmax.xlane.f32.xlu1 %v774_v50  ;;  %v4263_v51 = vpop.f32.mrf.mxu1 }
 0x324   : > { %v777_v54 = vsel %vm773_vm1, %v4263_v51, -inf }
 0x325   : > { %v4267_v53 = vpop.f32.mrf.mxu1 }
 0x326   : > { %v792_v56 = vsel %vm773_vm1, %v4267_v53, -inf }
 0x327   : > { %784 = vmax.xlane.f32.xlu1 %v783_v52  ;;  %v4271_v55 = vpop.f32.mrf.mxu1 }
 0x328   : > { %v786_v58 = vsel %vm773_vm1, %v4271_v55, -inf }
 0x329   : > { %v4275_v57 = vpop.f32.mrf.mxu1 }
 0x32a   : > { %v795_v61 = vsel %vm773_vm1, %v4275_v57, -inf }
 0x32b   : > { %778 = vmax.xlane.f32.xlu1 %v777_v54  ;;  %v4279_v59 = vpop.f32.mrf.mxu1 }
 0x32c   : > { %v789_v60 = vsel %vm773_vm1, %v4279_v59, -inf }
 0x32f   : > { %793 = vmax.xlane.f32.xlu1 %v792_v56 }
 0x333   : > { %787 = vmax.xlane.f32.xlu1 %v786_v58 }
 0x337   : > { %790 = vmax.xlane.f32.xlu1 %v789_v60 }
 0x33b   : > { %796 = vmax.xlane.f32.xlu1 %v795_v61 }
 0x3a8   : > { %v782_v1 = vpop.xlane.xlu1 %781 }
 0x3a9   : > { %vm800_vm2 = vcmp.ge.f32.partialorder %v4253_v46, %v782_v1 }
 0x3aa   : > { %v808_v2 = vsel %vm800_vm2, %v4285_v0, 64.0 }
 0x3ab   : > { %v820_v5 = vsel %vm773_vm1, %v808_v2, inf }
 0x3ac   : > { %v776_v8 = vpop.xlane.xlu1 %775  ;;  %821 = vmin.xlane.f32.xlu1 %v820_v5 }
 0x3ad   : > { %vm798_vm3 = vcmp.ge.f32.partialorder %v4257_v48, %v776_v8 }
 0x3ae   : > { %v806_v11 = vsel %vm798_vm3, %v4285_v0, 64.0 }
 0x3af   : > { %v814_v14 = vsel %vm773_vm1, %v806_v11, inf }
 0x3b0   : > { %v785_v15 = vpop.xlane.xlu1 %784  ;;  %815 = vmin.xlane.f32.xlu1 %v814_v14 }
 0x3b1   : > { %vm801_vm4 = vcmp.ge.f32.partialorder %v4259_v49, %v785_v15 }
 0x3b2   : > { %v809_v20 = vsel %vm801_vm4, %v4285_v0, 64.0 }
 0x3b3   : > { %v823_v22 = vsel %vm773_vm1, %v809_v20, inf }
 0x3b4   : > { %v779_v16 = vpop.xlane.xlu1 %778 }
 0x3b5   : > { %vm799_vm5 = vcmp.ge.f32.partialorder %v4263_v51, %v779_v16 }
 0x3b6   : > { %v807_v17 = vsel %vm799_vm5, %v4285_v0, 64.0 }
 0x3b7   : > { %v817_v18 = vsel %vm773_vm1, %v807_v17, inf }
 0x3b8   : > { %v794_v19 = vpop.xlane.xlu1 %793  ;;  %818 = vmin.xlane.f32.xlu1 %v817_v18 }
 0x3b9   : > { %vm804_vm6 = vcmp.ge.f32.partialorder %v4267_v53, %v794_v19 }
 0x3ba   : > { %v812_v29 = vsel %vm804_vm6, %v4285_v0, 64.0 }
 0x3bb   : > { %v832_v33 = vsel %vm773_vm1, %v812_v29, inf }
 0x3bc   : > { %v788_v26 = vpop.xlane.xlu1 %787  ;;  %824 = vmin.xlane.f32.xlu1 %v823_v22 }
 0x3bd   : > { %vm802_vm7 = vcmp.ge.f32.partialorder %v4271_v55, %v788_v26 }
 0x3be   : > { %v810_v27 = vsel %vm802_vm7, %v4285_v0, 64.0 }
 0x3bf   : > { %v826_v28 = vsel %vm773_vm1, %v810_v27, inf }
 0x3c0   : > { %827 = vmin.xlane.f32.xlu1 %v826_v28  ;;  %v791_v30 = vpop.xlane.xlu1 %790 }
 0x3c1   : > { %vm803_vm8 = vcmp.ge.f32.partialorder %v4279_v59, %v791_v30 }
 0x3c2   : > { %v811_v32 = vsel %vm803_vm8, %v4285_v0, 64.0 }
 0x3c3   : > { %v829_v31 = vsel %vm773_vm1, %v811_v32, inf }
 0x3c4   : > { %833 = vmin.xlane.f32.xlu1 %v832_v33  ;;  %830 = vmin.xlane.f32.xlu0 %v829_v31  ;;  %v797_v34 = vpop.xlane.xlu1 %796 }
 0x3c5   : > { %vm805_vm9 = vcmp.ge.f32.partialorder %v4275_v57, %v797_v34 }
 0x3c6   : > { %v813_v35 = vsel %vm805_vm9, %v4285_v0, 64.0 }
 0x3c7   : > { %v835_v36 = vsel %vm773_vm1, %v813_v35, inf }
 0x3c8   : > { %836 = vmin.xlane.f32.xlu0 %v835_v36 }
 0x435   : > { %v822_v37 = vpop.xlane.xlu1 %821 }
 0x436   : > { %vm840_vm10 = vcmp.eq.f32.partialorder %v4285_v0, %v822_v37 }
 0x437   : > { %v4323_v50 = vsel %vm840_vm10, -inf, %v4253_v46  ;;  %v3137_v46 = vsel %vm840_vm10, 1.0, %v3949_v39 }
 0x438   : > { %v1005_v52 = vsel %vm773_vm1, %v4323_v50, -inf }
 0x439   : > { %v816_v38 = vpop.xlane.xlu1 %815 }
 0x43a   : > { %vm838_vm11 = vcmp.eq.f32.partialorder %v4285_v0, %v816_v38 }
 0x43b   : > { %v3135_v40 = vsel %vm838_vm11, 1.0, %v3949_v39  ;;  %v4315_v21 = vsel %vm838_vm11, -inf, %v4257_v48 }
 0x43c   : > { %3528 = vmatprep.mubr.msk.f32.mxu1 %vm773_vm1, %v3135_v40  ;;  %v999_v47 = vsel %vm773_vm1, %v4315_v21, -inf }
 0x43d   : > { %1000 = vmax.xlane.f32.xlu1 %v999_v47 }
 0x441   : > { %1006 = vmax.xlane.f32.xlu1 %v1005_v52  ;;  %v819_v54 = vpop.xlane.xlu1 %818 }
 0x442   : > { %vm839_vm12 = vcmp.eq.f32.partialorder %v4285_v0, %v819_v54 }
 0x443   : > { %v3136_v48 = vsel %vm839_vm12, 1.0, %v3949_v39  ;;  %v4330_v56 = vsel %vm839_vm12, -inf, %v4263_v51 }
 0x444   : > { %3529 = vmatmul.mubr.msk.f32.vlgmr.msra.gmra.mxu1 %vm773_vm1, %v3136_v48  ;;  %v1002_v58 = vsel %vm773_vm1, %v4330_v56, -inf }
 0x445   : > { %3569 = vmatpush3.msra.mxu1 %v4215_v44  ;;  %1003 = vmax.xlane.f32.xlu0 %v1002_v58  ;;  %v825_v60 = vpop.xlane.xlu1 %824 }
 0x446   : > { %3531 = vmatprep.mubr.msk.f32.mxu1 %vm773_vm1, %v3137_v46  ;;  %3570 = vmatprep.subr.mxu1 %v4210_v24  ;;  %vm841_vm13 = vcmp.eq.f32.partialorder %v4285_v0, %v825_v60 }
 0x447   : > { %v3138_v51 = vsel %vm841_vm13, 1.0, %v3949_v39  ;;  %3571 = vmatpush3.msra.mxu1 %v4210_v24  ;;  %v4345_v61 = vsel %vm841_vm13, -inf, %v4259_v49 }
 0x448   : > { %3572 = vmatprep.subr.mxu1 %v4223_v45  ;;  %3532 = vmatmul.mubr.msk.f32.gmra.mxu1 %vm773_vm1, %v3138_v51  ;;  %v1008_v62 = vsel %vm773_vm1, %v4345_v61, -inf }
 0x449   : > { %3573 = vmatpush3.msra.mxu1 %v4223_v45  ;;  %1009 = vmax.xlane.f32.xlu0 %v1008_v62  ;;  %v828_v63 = vpop.xlane.xlu1 %827 }
 0x44a   : > { %3574 = vmatprep.subr.mxu1 %v4212_v43  ;;  %vm842_vm14 = vcmp.eq.f32.partialorder %v4285_v0, %v828_v63 }
 0x44b   : > { %v3139_v1 = vsel %vm842_vm14, 1.0, %v3949_v39  ;;  %3575 = vmatpush3.msra.mxu1 %v4212_v43  ;;  %v4357_v49 = vsel %vm842_vm14, -inf, %v4271_v55 }
 0x44c   : > { %3576 = vmatprep.subr.mxu1 %v4204_v42  ;;  %3534 = vmatprep.mubr.msk.f32.mxu1 %vm773_vm1, %v3139_v1  ;;  %v1011_v2 = vsel %vm773_vm1, %v4357_v49, -inf }
 0x44d   : > { %3577 = vmatpush3.msra.mxu1 %v4204_v42  ;;  %v831_v5 = vpop.xlane.xlu0 %830  ;;  %1012 = vmax.xlane.f32.xlu1 %v1011_v2  ;;  %v834_v8 = vpop.xlane.xlu1 %833 }
 0x44e   : > { %vm843_vm15 = vcmp.eq.f32.partialorder %v4285_v0, %v831_v5  ;;  %3578 = vmatprep.subr.mxu1 %v4199_v25  ;;  %vm844_vm0 = vcmp.eq.f32.partialorder %v4285_v0, %v834_v8 }
 0x44f   : > { %v3140_v55 = vsel %vm843_vm15, 1.0, %v3949_v39  ;;  %3579 = vmatpush3.msra.mxu1 %v4199_v25  ;;  %v4370_v11 = vsel %vm843_vm15, -inf, %v4279_v59  ;;  %v4373_v14 = vsel %vm844_vm0, -inf, %v4267_v53  ;;  %v3141_v15 = vsel %vm844_vm0, 1.0, %v3949_v39 }
 0x450   : > { %3580 = vmatprep.subr.mxu1 %v4208_v23  ;;  %3535 = vmatmul.mubr.msk.f32.gmra.mxu1 %vm773_vm1, %v3140_v55  ;;  %v1014_v16 = vsel %vm773_vm1, %v4370_v11, -inf  ;;  %v1017_v17 = vsel %vm773_vm1, %v4373_v14, -inf }
 0x451   : > { %3581 = vmatpush3.msra.mxu1 %v4208_v23  ;;  %v837_v18 = vpop.xlane.xlu0 %836  ;;  %1015 = vmax.xlane.f32.xlu0 %v1014_v16 }
 0x452   : > { %vm845_vm2 = vcmp.eq.f32.partialorder %v4285_v0, %v837_v18  ;;  %3582 = vmatprep.subr.mxu1 %v4202_v41  ;;  %1018 = vmax.xlane.f32.xlu1 %v1017_v17 }
 0x453   : > { %v3142_v53 = vsel %vm845_vm2, 1.0, %v3949_v39  ;;  %3537 = vmatprep.mubr.msk.f32.mxu1 %vm773_vm1, %v3141_v15  ;;  %3583 = vmatpush3.msra.mxu1 %v4202_v41  ;;  %v4389_v59 = vsel %vm845_vm2, -inf, %v4275_v57 }
 0x454   : > { %3624 = vmatprep.subr.mxu1 %v4215_v44  ;;  %3538 = vmatmul.mubr.msk.f32.gmra.mxu1 %vm773_vm1, %v3142_v53  ;;  %v1020_v19 = vsel %vm773_vm1, %v4389_v59, -inf }
 0x455   : > { %1021 = vmax.xlane.f32.xlu0 %v1020_v19 }
 0x4c6   : > { %v1001_v20 = vpop.xlane.xlu1 %1000 }
 0x4c7   : > { %vm1023_vm3 = vcmp.ge.f32.partialorder %v4315_v21, %v1001_v20 }
 0x4c8   : > { %v1031_v22 = vsel %vm1023_vm3, %v4285_v0, 64.0 }
 0x4c9   : > { %v1039_v26 = vsel %vm773_vm1, %v1031_v22, inf }
 0x4ca   : > { %1040 = vmin.xlane.f32.xlu1 %v1039_v26  ;;  %v1007_v27 = vpop.xlane.xlu1 %1006 }
 0x4cb   : > { %vm1025_vm4 = vcmp.ge.f32.partialorder %v4323_v50, %v1007_v27 }
 0x4cc   : > { %v1033_v57 = vsel %vm1025_vm4, %v4285_v0, 64.0 }
 0x4cd   : > { %v1045_v28 = vsel %vm773_vm1, %v1033_v57, inf }
 0x4ce   : > { %v1004_v30 = vpop.xlane.xlu0 %1003  ;;  %1046 = vmin.xlane.f32.xlu1 %v1045_v28 }
 0x4cf   : > { %vm1024_vm5 = vcmp.ge.f32.partialorder %v4330_v56, %v1004_v30 }
 0x4d0   : > { %v1032_v29 = vsel %vm1024_vm5, %v4285_v0, 64.0 }
 0x4d1   : > { %v1042_v32 = vsel %vm773_vm1, %v1032_v29, inf }
 0x4d2   : > { %1043 = vmin.xlane.f32.xlu0 %v1042_v32  ;;  %v1010_v33 = vpop.xlane.xlu0 %1009 }
 0x4d3   : > { %vm1026_vm6 = vcmp.ge.f32.partialorder %v4345_v61, %v1010_v33 }
 0x4d4   : > { %v1034_v31 = vsel %vm1026_vm6, %v4285_v0, 64.0 }
 0x4d5   : > { %v1048_v34 = vsel %vm773_vm1, %v1034_v31, inf }
 0x4d6   : > { %1049 = vmin.xlane.f32.xlu0 %v1048_v34  ;;  %v1013_v35 = vpop.xlane.xlu1 %1012 }
 0x4d7   : > { %vm1027_vm7 = vcmp.ge.f32.partialorder %v4357_v49, %v1013_v35 }
 0x4d8   : > { %v1035_v36 = vsel %vm1027_vm7, %v4285_v0, 64.0 }
 0x4d9   : > { %v1051_v37 = vsel %vm773_vm1, %v1035_v36, inf }
 0x4da   : > { %v1016_v38 = vpop.xlane.xlu0 %1015  ;;  %1052 = vmin.xlane.f32.xlu1 %v1051_v37 }
 0x4db   : > { %vm1028_vm8 = vcmp.ge.f32.partialorder %v4370_v11, %v1016_v38  ;;  %v1019_v40 = vpop.xlane.xlu1 %1018 }
 0x4dc   : > { %vm1029_vm9 = vcmp.ge.f32.partialorder %v4373_v14, %v1019_v40  ;;  %v1036_v47 = vsel %vm1028_vm8, %v4285_v0, 64.0 }
 0x4dd   : > { %v1054_v52 = vsel %vm773_vm1, %v1036_v47, inf  ;;  %v1037_v54 = vsel %vm1029_vm9, %v4285_v0, 64.0 }
 0x4de   : > { %1055 = vmin.xlane.f32.xlu0 %v1054_v52  ;;  %v1022_v48 = vpop.xlane.xlu0 %1021  ;;  %v1057_v58 = vsel %vm773_vm1, %v1037_v54, inf }
 0x4df   : > { %vm1030_vm10 = vcmp.ge.f32.partialorder %v4389_v59, %v1022_v48  ;;  %1058 = vmin.xlane.f32.xlu1 %v1057_v58 }
 0x4e0   : > { %v1038_v46 = vsel %vm1030_vm10, %v4285_v0, 64.0 }
 0x4e1   : > { %v1060_v60 = vsel %vm773_vm1, %v1038_v46, inf }
 0x4e2   : > { %1061 = vmin.xlane.f32.xlu0 %v1060_v60 }
 0x553   : > { %v1041_v51 = vpop.xlane.xlu1 %1040 }
 0x554   : > { %vm1063_vm11 = vcmp.eq.f32.partialorder %v4285_v0, %v1041_v51 }
 0x555   : > { %v3151_v62 = vsel %vm1063_vm11, 1.0, %v3949_v39  ;;  %v4422_v63 = vsel %vm1063_vm11, -inf, %v4315_v21 }
 0x556   : > { %3556 = vmatprep.mubr.msk.f32.mxu0 %vm773_vm1, %v3151_v62  ;;  %v1232_v1 = vsel %vm773_vm1, %v4422_v63, -inf }
 0x557   : > { %1233 = vmax.xlane.f32.xlu1 %v1232_v1  ;;  %v1047_v2 = vpop.xlane.xlu1 %1046 }
 0x558   : > { %vm1065_vm12 = vcmp.eq.f32.partialorder %v4285_v0, %v1047_v2 }
 0x559   : > { %v4429_v5 = vsel %vm1065_vm12, -inf, %v4323_v50  ;;  %v3153_v50 = vsel %vm1065_vm12, 1.0, %v3949_v39 }
 0x55a   : > { %v1238_v8 = vsel %vm773_vm1, %v4429_v5, -inf }
 0x55b   : > { %v1044_v55 = vpop.xlane.xlu0 %1043  ;;  %1239 = vmax.xlane.f32.xlu1 %v1238_v8 }
 0x55c   : > { %vm1064_vm13 = vcmp.eq.f32.partialorder %v4285_v0, %v1044_v55 }
 0x55d   : > { %v3152_v21 = vsel %vm1064_vm13, 1.0, %v3949_v39  ;;  %v4436_v15 = vsel %vm1064_vm13, -inf, %v4330_v56 }
 0x55e   : > { %3557 = vmatmul.mubr.msk.f32.vlgmr.msra.gmra.mxu0 %vm773_vm1, %v3152_v21  ;;  %v1235_v16 = vsel %vm773_vm1, %v4436_v15, -inf }
 0x55f   : > { %3597 = vmatpush3.msra.mxu0 %v4215_v44  ;;  %1236 = vmax.xlane.f32.xlu0 %v1235_v16  ;;  %v1050_v17 = vpop.xlane.xlu0 %1049 }
 0x560   : > { %vm1066_vm14 = vcmp.eq.f32.partialorder %v4285_v0, %v1050_v17  ;;  %3559 = vmatprep.mubr.msk.f32.mxu0 %vm773_vm1, %v3153_v50  ;;  %3598 = vmatprep.subr.mxu0 %v4210_v24 }
 0x561   : > { %v3154_v56 = vsel %vm1066_vm14, 1.0, %v3949_v39  ;;  %3599 = vmatpush3.msra.mxu0 %v4210_v24  ;;  %v4449_v18 = vsel %vm1066_vm14, -inf, %v4345_v61 }
 0x562   : > { %3600 = vmatprep.subr.mxu0 %v4223_v45  ;;  %3560 = vmatmul.mubr.msk.f32.gmra.mxu0 %vm773_vm1, %v3154_v56  ;;  %v1241_v53 = vsel %vm773_vm1, %v4449_v18, -inf }
 0x563   : > { %3601 = vmatpush3.msra.mxu0 %v4223_v45  ;;  %1242 = vmax.xlane.f32.xlu0 %v1241_v53  ;;  %v1053_v19 = vpop.xlane.xlu1 %1052 }
 0x564   : > { %3602 = vmatprep.subr.mxu0 %v4212_v43  ;;  %vm1067_vm15 = vcmp.eq.f32.partialorder %v4285_v0, %v1053_v19 }
 0x565   : > { %v3155_v20 = vsel %vm1067_vm15, 1.0, %v3949_v39  ;;  %3603 = vmatpush3.msra.mxu0 %v4212_v43  ;;  %v4461_v61 = vsel %vm1067_vm15, -inf, %v4357_v49 }
 0x566   : > { %3604 = vmatprep.subr.mxu0 %v4204_v42  ;;  %3562 = vmatprep.mubr.msk.f32.mxu0 %vm773_vm1, %v3155_v20  ;;  %v1244_v22 = vsel %vm773_vm1, %v4461_v61, -inf }
 0x567   : > { %3605 = vmatpush3.msra.mxu0 %v4204_v42  ;;  %v1056_v26 = vpop.xlane.xlu0 %1055  ;;  %1245 = vmax.xlane.f32.xlu1 %v1244_v22 }
 0x568   : > { %vm1068_vm0 = vcmp.eq.f32.partialorder %v4285_v0, %v1056_v26  ;;  %3606 = vmatprep.subr.mxu0 %v4199_v25  ;;  %v1059_v27 = vpop.xlane.xlu1 %1058 }
 0x569   : > { %v3156_v57 = vsel %vm1068_vm0, 1.0, %v3949_v39  ;;  %vm1069_vm2 = vcmp.eq.f32.partialorder %v4285_v0, %v1059_v27  ;;  %3607 = vmatpush3.msra.mxu0 %v4199_v25  ;;  %v4474_v49 = vsel %vm1068_vm0, -inf, %v4370_v11 }
 0x56a   : > { %v3157_v28 = vsel %vm1069_vm2, 1.0, %v3949_v39  ;;  %3608 = vmatprep.subr.mxu0 %v4208_v23  ;;  %3563 = vmatmul.mubr.msk.f32.gmra.mxu0 %vm773_vm1, %v3156_v57  ;;  %v1247_v30 = vsel %vm773_vm1, %v4474_v49, -inf  ;;  %v4482_v29 = vsel %vm1069_vm2, -inf, %v4373_v14 }
 0x56b   : > { %3609 = vmatpush3.msra.mxu0 %v4208_v23  ;;  %1248 = vmax.xlane.f32.xlu0 %v1247_v30  ;;  %v1062_v32 = vpop.xlane.xlu0 %1061  ;;  %v1250_v11 = vsel %vm773_vm1, %v4482_v29, -inf }
 0x56c   : > { %vm1070_vm3 = vcmp.eq.f32.partialorder %v4285_v0, %v1062_v32  ;;  %3610 = vmatprep.subr.mxu0 %v4202_v41  ;;  %1251 = vmax.xlane.f32.xlu1 %v1250_v11 }
 0x56d   : > { %v3158_v33 = vsel %vm1070_vm3, 1.0, %v3949_v39  ;;  %3565 = vmatprep.mubr.msk.f32.mxu0 %vm773_vm1, %v3157_v28  ;;  %3611 = vmatpush3.msra.mxu0 %v4202_v41  ;;  %v4493_v14 = vsel %vm1070_vm3, -inf, %v4389_v59 }
 0x56e   : > { %3652 = vmatprep.subr.mxu0 %v4215_v44  ;;  %3566 = vmatmul.mubr.msk.f32.gmra.mxu0 %vm773_vm1, %v3158_v33  ;;  %v1253_v31 = vsel %vm773_vm1, %v4493_v14, -inf }
 0x56f   : > { %1254 = vmax.xlane.f32.xlu0 %v1253_v31 }
 0x5e0   : > { %v1234_v34 = vpop.xlane.xlu1 %1233 }
 0x5e1   : > { %vm1256_vm4 = vcmp.ge.f32.partialorder %v4422_v63, %v1234_v34 }
 0x5e2   : > { %v1264_v35 = vsel %vm1256_vm4, %v4285_v0, 64.0 }
 0x5e3   : > { %v1272_v36 = vsel %vm773_vm1, %v1264_v35, inf }
 0x5e4   : > { %1273 = vmin.xlane.f32.xlu1 %v1272_v36  ;;  %v1240_v37 = vpop.xlane.xlu1 %1239 }
 0x5e5   : > { %vm1258_vm5 = vcmp.ge.f32.partialorder %v4429_v5, %v1240_v37 }
 0x5e6   : > { %v1266_v59 = vsel %vm1258_vm5, %v4285_v0, 64.0 }
 0x5e7   : > { %v1278_v38 = vsel %vm773_vm1, %v1266_v59, inf }
 0x5e8   : > { %v1237_v40 = vpop.xlane.xlu0 %1236  ;;  %1279 = vmin.xlane.f32.xlu1 %v1278_v38 }
 0x5e9   : > { %vm1257_vm6 = vcmp.ge.f32.partialorder %v4436_v15, %v1237_v40 }
 0x5ea   : > { %v1265_v47 = vsel %vm1257_vm6, %v4285_v0, 64.0 }
 0x5eb   : > { %v1275_v52 = vsel %vm773_vm1, %v1265_v47, inf }
 0x5ec   : > { %1276 = vmin.xlane.f32.xlu0 %v1275_v52  ;;  %v1243_v54 = vpop.xlane.xlu0 %1242 }
 0x5ed   : > { %vm1259_vm7 = vcmp.ge.f32.partialorder %v4449_v18, %v1243_v54 }
 0x5ee   : > { %v1267_v48 = vsel %vm1259_vm7, %v4285_v0, 64.0 }
 0x5ef   : > { %v1281_v58 = vsel %vm773_vm1, %v1267_v48, inf }
 0x5f0   : > { %1282 = vmin.xlane.f32.xlu0 %v1281_v58  ;;  %v1246_v46 = vpop.xlane.xlu1 %1245 }
 0x5f1   : > { %vm1260_vm8 = vcmp.ge.f32.partialorder %v4461_v61, %v1246_v46 }
 0x5f2   : > { %v1268_v60 = vsel %vm1260_vm8, %v4285_v0, 64.0 }
 0x5f3   : > { %v1284_v51 = vsel %vm773_vm1, %v1268_v60, inf }
 0x5f4   : > { %v1249_v62 = vpop.xlane.xlu0 %1248  ;;  %1285 = vmin.xlane.f32.xlu1 %v1284_v51 }
 0x5f5   : > { %vm1261_vm9 = vcmp.ge.f32.partialorder %v4474_v49, %v1249_v62  ;;  %v1252_v1 = vpop.xlane.xlu1 %1251 }
 0x5f6   : > { %vm1262_vm10 = vcmp.ge.f32.partialorder %v4482_v29, %v1252_v1  ;;  %v1269_v2 = vsel %vm1261_vm9, %v4285_v0, 64.0 }
 0x5f7   : > { %v1287_v8 = vsel %vm773_vm1, %v1269_v2, inf  ;;  %v1270_v55 = vsel %vm1262_vm10, %v4285_v0, 64.0 }
 0x5f8   : > { %1288 = vmin.xlane.f32.xlu0 %v1287_v8  ;;  %v1255_v21 = vpop.xlane.xlu0 %1254  ;;  %v1290_v16 = vsel %vm773_vm1, %v1270_v55, inf }
 0x5f9   : > { %vm1263_vm11 = vcmp.ge.f32.partialorder %v4493_v14, %v1255_v21  ;;  %1291 = vmin.xlane.f32.xlu1 %v1290_v16 }
 0x5fa   : > { %v1271_v50 = vsel %vm1263_vm11, %v4285_v0, 64.0 }
 0x5fb   : > { %v1293_v17 = vsel %vm773_vm1, %v1271_v50, inf }
 0x5fc   : > { %1294 = vmin.xlane.f32.xlu0 %v1293_v17 }
 0x66d   : > { %v1274_v56 = vpop.xlane.xlu1 %1273 }
 0x66e   : > { %vm1296_vm12 = vcmp.eq.f32.partialorder %v4285_v0, %v1274_v56 }
 0x66f   : > { %v3167_v53 = vsel %vm1296_vm12, 1.0, %v3949_v39  ;;  %v4526_v19 = vsel %vm1296_vm12, -inf, %v4422_v63 }
 0x670   : > { %3584 = vmatprep.mubr.msk.f32.mxu1 %vm773_vm1, %v3167_v53  ;;  %v1465_v20 = vsel %vm773_vm1, %v4526_v19, -inf }
 0x671   : > { %1466 = vmax.xlane.f32.xlu1 %v1465_v20  ;;  %v1280_v22 = vpop.xlane.xlu1 %1279 }
 0x672   : > { %vm1298_vm13 = vcmp.eq.f32.partialorder %v4285_v0, %v1280_v22 }
 0x673   : > { %v4533_v26 = vsel %vm1298_vm13, -inf, %v4429_v5  ;;  %v3169_v5 = vsel %vm1298_vm13, 1.0, %v3949_v39 }
 0x674   : > { %v1471_v27 = vsel %vm773_vm1, %v4533_v26, -inf }
 0x675   : > { %v1277_v57 = vpop.xlane.xlu0 %1276  ;;  %1472 = vmax.xlane.f32.xlu1 %v1471_v27 }
 0x676   : > { %vm1297_vm14 = vcmp.eq.f32.partialorder %v4285_v0, %v1277_v57 }
 0x677   : > { %v3168_v63 = vsel %vm1297_vm14, 1.0, %v3949_v39  ;;  %v4540_v28 = vsel %vm1297_vm14, -inf, %v4436_v15 }
 0x678   : > { %3585 = vmatmul.mubr.msk.f32.vlgmr.msra.gmra.mxu1 %vm773_vm1, %v3168_v63  ;;  %v1468_v30 = vsel %vm773_vm1, %v4540_v28, -inf }
 0x679   : > { %3625 = vmatpush3.msra.mxu1 %v4215_v44  ;;  %1469 = vmax.xlane.f32.xlu0 %v1468_v30  ;;  %v1283_v32 = vpop.xlane.xlu0 %1282 }
 0x67a   : > { %vm1299_vm15 = vcmp.eq.f32.partialorder %v4285_v0, %v1283_v32  ;;  %3587 = vmatprep.mubr.msk.f32.mxu1 %vm773_vm1, %v3169_v5  ;;  %3626 = vmatprep.subr.mxu1 %v4210_v24 }
 0x67b   : > { %v3170_v15 = vsel %vm1299_vm15, 1.0, %v3949_v39  ;;  %3627 = vmatpush3.msra.mxu1 %v4210_v24  ;;  %v4553_v11 = vsel %vm1299_vm15, -inf, %v4449_v18 }
 0x67c   : > { %3628 = vmatprep.subr.mxu1 %v4223_v45  ;;  %3588 = vmatmul.mubr.msk.f32.gmra.mxu1 %vm773_vm1, %v3170_v15  ;;  %v1474_v33 = vsel %vm773_vm1, %v4553_v11, -inf }
 0x67d   : > { %3629 = vmatpush3.msra.mxu1 %v4223_v45  ;;  %1475 = vmax.xlane.f32.xlu0 %v1474_v33  ;;  %v1286_v31 = vpop.xlane.xlu1 %1285 }
 0x67e   : > { %3630 = vmatprep.subr.mxu1 %v4212_v43  ;;  %vm1300_vm0 = vcmp.eq.f32.partialorder %v4285_v0, %v1286_v31 }
 0x67f   : > { %v3171_v34 = vsel %vm1300_vm0, 1.0, %v3949_v39  ;;  %3631 = vmatpush3.msra.mxu1 %v4212_v43  ;;  %v4565_v18 = vsel %vm1300_vm0, -inf, %v4461_v61 }
 0x680   : > { %3632 = vmatprep.subr.mxu1 %v4204_v42  ;;  %3590 = vmatprep.mubr.msk.f32.mxu1 %vm773_vm1, %v3171_v34  ;;  %v1477_v35 = vsel %vm773_vm1, %v4565_v18, -inf }
 0x681   : > { %3633 = vmatpush3.msra.mxu1 %v4204_v42  ;;  %v1289_v36 = vpop.xlane.xlu0 %1288  ;;  %1478 = vmax.xlane.f32.xlu1 %v1477_v35 }
 0x682   : > { %vm1301_vm2 = vcmp.eq.f32.partialorder %v4285_v0, %v1289_v36  ;;  %3634 = vmatprep.subr.mxu1 %v4199_v25  ;;  %v1292_v37 = vpop.xlane.xlu1 %1291 }
 0x683   : > { %v3172_v59 = vsel %vm1301_vm2, 1.0, %v3949_v39  ;;  %vm1302_vm3 = vcmp.eq.f32.partialorder %v4285_v0, %v1292_v37  ;;  %3635 = vmatpush3.msra.mxu1 %v4199_v25  ;;  %v4578_v61 = vsel %vm1301_vm2, -inf, %v4474_v49 }
 0x684   : > { %v3173_v38 = vsel %vm1302_vm3, 1.0, %v3949_v39  ;;  %v4582_v40 = vsel %vm1302_vm3, -inf, %v4482_v29  ;;  %3636 = vmatprep.subr.mxu1 %v4208_v23  ;;  %3591 = vmatmul.mubr.msk.f32.gmra.mxu1 %vm773_vm1, %v3172_v59  ;;  %v1480_v47 = vsel %vm773_vm1, %v4578_v61, -inf }
 0x685   : > { %3637 = vmatpush3.msra.mxu1 %v4208_v23  ;;  %1481 = vmax.xlane.f32.xlu0 %v1480_v47  ;;  %v1295_v52 = vpop.xlane.xlu0 %1294  ;;  %v1483_v49 = vsel %vm773_vm1, %v4582_v40, -inf }
 0x686   : > { %vm1303_vm4 = vcmp.eq.f32.partialorder %v4285_v0, %v1295_v52  ;;  %3638 = vmatprep.subr.mxu1 %v4202_v41  ;;  %1484 = vmax.xlane.f32.xlu1 %v1483_v49 }
 0x687   : > { %v3174_v29 = vsel %vm1303_vm4, 1.0, %v3949_v39  ;;  %v4595_v54 = vsel %vm1303_vm4, -inf, %v4493_v14  ;;  %3593 = vmatprep.mubr.msk.f32.mxu1 %vm773_vm1, %v3173_v38  ;;  %3639 = vmatpush3.msra.mxu1 %v4202_v41 }
 0x688   : > { %3680 = vmatprep.subr.mxu1 %v4215_v44  ;;  %3594 = vmatmul.mubr.msk.f32.gmra.mxu1 %vm773_vm1, %v3174_v29  ;;  %v1486_v48 = vsel %vm773_vm1, %v4595_v54, -inf }
 0x689   : > { %1487 = vmax.xlane.f32.xlu0 %v1486_v48 }
 0x6fa   : > { %v1467_v58 = vpop.xlane.xlu1 %1466 }
 0x6fb   : > { %vm1489_vm5 = vcmp.ge.f32.partialorder %v4526_v19, %v1467_v58 }
 0x6fc   : > { %v1497_v46 = vsel %vm1489_vm5, %v4285_v0, 64.0 }
 0x6fd   : > { %v1505_v14 = vsel %vm773_vm1, %v1497_v46, inf }
 0x6fe   : > { %1506 = vmin.xlane.f32.xlu1 %v1505_v14  ;;  %v1473_v60 = vpop.xlane.xlu1 %1472 }
 0x6ff   : > { %vm1491_vm6 = vcmp.ge.f32.partialorder %v4533_v26, %v1473_v60 }
 0x700   : > { %v1499_v51 = vsel %vm1491_vm6, %v4285_v0, 64.0 }
 0x701   : > { %v1511_v62 = vsel %vm773_vm1, %v1499_v51, inf }
 0x702   : > { %v1470_v1 = vpop.xlane.xlu0 %1469  ;;  %1512 = vmin.xlane.f32.xlu1 %v1511_v62 }
 0x703   : > { %vm1490_vm7 = vcmp.ge.f32.partialorder %v4540_v28, %v1470_v1 }
 0x704   : > { %v1498_v2 = vsel %vm1490_vm7, %v4285_v0, 64.0 }
 0x705   : > { %v1508_v8 = vsel %vm773_vm1, %v1498_v2, inf }
 0x706   : > { %1509 = vmin.xlane.f32.xlu0 %v1508_v8  ;;  %v1476_v55 = vpop.xlane.xlu0 %1475 }
 0x707   : > { %vm1492_vm8 = vcmp.ge.f32.partialorder %v4553_v11, %v1476_v55 }
 0x708   : > { %v1500_v21 = vsel %vm1492_vm8, %v4285_v0, 64.0 }
 0x709   : > { %v1514_v16 = vsel %vm773_vm1, %v1500_v21, inf }
 0x70a   : > { %1515 = vmin.xlane.f32.xlu0 %v1514_v16  ;;  %v1479_v50 = vpop.xlane.xlu1 %1478 }
 0x70b   : > { %vm1493_vm9 = vcmp.ge.f32.partialorder %v4565_v18, %v1479_v50 }
 0x70c   : > { %v1501_v17 = vsel %vm1493_vm9, %v4285_v0, 64.0 }
 0x70d   : > { %v1517_v56 = vsel %vm773_vm1, %v1501_v17, inf }
 0x70e   : > { %v1482_v53 = vpop.xlane.xlu0 %1481  ;;  %1518 = vmin.xlane.f32.xlu1 %v1517_v56 }
 0x70f   : > { %vm1494_vm10 = vcmp.ge.f32.partialorder %v4578_v61, %v1482_v53  ;;  %v1485_v20 = vpop.xlane.xlu1 %1484 }
 0x710   : > { %vm1495_vm11 = vcmp.ge.f32.partialorder %v4582_v40, %v1485_v20  ;;  %v1502_v22 = vsel %vm1494_vm10, %v4285_v0, 64.0 }
 0x711   : > { %v1520_v27 = vsel %vm773_vm1, %v1502_v22, inf  ;;  %v1503_v57 = vsel %vm1495_vm11, %v4285_v0, 64.0 }
 0x712   : > { %1521 = vmin.xlane.f32.xlu0 %v1520_v27  ;;  %v1488_v63 = vpop.xlane.xlu0 %1487  ;;  %v1523_v30 = vsel %vm773_vm1, %v1503_v57, inf }
 0x713   : > { %vm1496_vm12 = vcmp.ge.f32.partialorder %v4595_v54, %v1488_v63  ;;  %1524 = vmin.xlane.f32.xlu1 %v1523_v30 }
 0x714   : > { %v1504_v5 = vsel %vm1496_vm12, %v4285_v0, 64.0 }
 0x715   : > { %v1526_v32 = vsel %vm773_vm1, %v1504_v5, inf }
 0x716   : > { %1527 = vmin.xlane.f32.xlu0 %v1526_v32 }
 0x787   : > { %v1507_v15 = vpop.xlane.xlu1 %1506 }
 0x788   : > { %vm1529_vm13 = vcmp.eq.f32.partialorder %v4285_v0, %v1507_v15 }
 0x789   : > { %v3183_v33 = vsel %vm1529_vm13, 1.0, %v3949_v39  ;;  %v4630_v31 = vsel %vm1529_vm13, -inf, %v4526_v19 }
 0x78a   : > { %3612 = vmatprep.mubr.msk.f32.mxu0 %vm773_vm1, %v3183_v33  ;;  %v1698_v34 = vsel %vm773_vm1, %v4630_v31, -inf }
 0x78b   : > { %1699 = vmax.xlane.f32.xlu1 %v1698_v34  ;;  %v1513_v35 = vpop.xlane.xlu1 %1512 }
 0x78c   : > { %vm1531_vm14 = vcmp.eq.f32.partialorder %v4285_v0, %v1513_v35 }
 0x78d   : > { %v4637_v36 = vsel %vm1531_vm14, -inf, %v4533_v26  ;;  %v3185_v26 = vsel %vm1531_vm14, 1.0, %v3949_v39 }
 0x78e   : > { %v1704_v37 = vsel %vm773_vm1, %v4637_v36, -inf }
 0x78f   : > { %v1510_v59 = vpop.xlane.xlu0 %1509  ;;  %1705 = vmax.xlane.f32.xlu1 %v1704_v37 }
 0x790   : > { %vm1530_vm15 = vcmp.eq.f32.partialorder %v4285_v0, %v1510_v59 }
 0x791   : > { %v3184_v19 = vsel %vm1530_vm15, 1.0, %v3949_v39  ;;  %v4644_v38 = vsel %vm1530_vm15, -inf, %v4540_v28 }
 0x792   : > { %3613 = vmatmul.mubr.msk.f32.vlgmr.msra.gmra.mxu0 %vm773_vm1, %v3184_v19  ;;  %v1701_v47 = vsel %vm773_vm1, %v4644_v38, -inf }
 0x793   : > { %3653 = vmatpush3.msra.mxu0 %v4215_v44  ;;  %1702 = vmax.xlane.f32.xlu0 %v1701_v47  ;;  %v1516_v52 = vpop.xlane.xlu0 %1515 }
 0x794   : > { %vm1532_vm0 = vcmp.eq.f32.partialorder %v4285_v0, %v1516_v52  ;;  %3615 = vmatprep.mubr.msk.f32.mxu0 %vm773_vm1, %v3185_v26  ;;  %3654 = vmatprep.subr.mxu0 %v4210_v24 }
 0x795   : > { %v3186_v28 = vsel %vm1532_vm0, 1.0, %v3949_v39  ;;  %v4656_v49 = vsel %vm1532_vm0, -inf, %v4553_v11  ;;  %3655 = vmatpush3.msra.mxu0 %v4210_v24 }
 0x796   : > { %3656 = vmatprep.subr.mxu0 %v4223_v45  ;;  %3616 = vmatmul.mubr.msk.f32.gmra.mxu0 %vm773_vm1, %v3186_v28  ;;  %v1707_v29 = vsel %vm773_vm1, %v4656_v49, -inf }
 0x797   : > { %3657 = vmatpush3.msra.mxu0 %v4223_v45  ;;  %1708 = vmax.xlane.f32.xlu0 %v1707_v29  ;;  %v1519_v48 = vpop.xlane.xlu1 %1518 }
 0x798   : > { %3658 = vmatprep.subr.mxu0 %v4212_v43  ;;  %vm1533_vm2 = vcmp.eq.f32.partialorder %v4285_v0, %v1519_v48 }
 0x799   : > { %v3187_v11 = vsel %vm1533_vm2, 1.0, %v3949_v39  ;;  %v4668_v58 = vsel %vm1533_vm2, -inf, %v4565_v18  ;;  %3659 = vmatpush3.msra.mxu0 %v4212_v43 }
 0x79a   : > { %3660 = vmatprep.subr.mxu0 %v4204_v42  ;;  %3618 = vmatprep.mubr.msk.f32.mxu0 %vm773_vm1, %v3187_v11  ;;  %v1710_v46 = vsel %vm773_vm1, %v4668_v58, -inf }
 0x79b   : > { %3661 = vmatpush3.msra.mxu0 %v4204_v42  ;;  %v1522_v14 = vpop.xlane.xlu0 %1521  ;;  %1711 = vmax.xlane.f32.xlu1 %v1710_v46 }
 0x79c   : > { %vm1534_vm3 = vcmp.eq.f32.partialorder %v4285_v0, %v1522_v14  ;;  %3662 = vmatprep.subr.mxu0 %v4199_v25  ;;  %v1525_v60 = vpop.xlane.xlu1 %1524 }
 0x79d   : > { %v3188_v18 = vsel %vm1534_vm3, 1.0, %v3949_v39  ;;  %v4680_v51 = vsel %vm1534_vm3, -inf, %v4578_v61  ;;  %vm1535_vm4 = vcmp.eq.f32.partialorder %v4285_v0, %v1525_v60  ;;  %3663 = vmatpush3.msra.mxu0 %v4199_v25 }
 0x79e   : > { %v3189_v62 = vsel %vm1535_vm4, 1.0, %v3949_v39  ;;  %v4686_v1 = vsel %vm1535_vm4, -inf, %v4582_v40  ;;  %3664 = vmatprep.subr.mxu0 %v4208_v23  ;;  %3619 = vmatmul.mubr.msk.f32.gmra.mxu0 %vm773_vm1, %v3188_v18  ;;  %v1713_v2 = vsel %vm773_vm1, %v4680_v51, -inf }
 0x79f   : > { %3665 = vmatpush3.msra.mxu0 %v4208_v23  ;;  %1714 = vmax.xlane.f32.xlu0 %v1713_v2  ;;  %v1528_v61 = vpop.xlane.xlu0 %1527  ;;  %v1716_v8 = vsel %vm773_vm1, %v4686_v1, -inf }
 0x7a0   : > { %vm1536_vm5 = vcmp.eq.f32.partialorder %v4285_v0, %v1528_v61  ;;  %3666 = vmatprep.subr.mxu0 %v4202_v41  ;;  %1717 = vmax.xlane.f32.xlu1 %v1716_v8 }
 0x7a1   : > { %v3190_v40 = vsel %vm1536_vm5, 1.0, %v3949_v39  ;;  %v4699_v55 = vsel %vm1536_vm5, -inf, %v4595_v54  ;;  %3621 = vmatprep.mubr.msk.f32.mxu0 %vm773_vm1, %v3189_v62  ;;  %3667 = vmatpush3.msra.mxu0 %v4202_v41 }
 0x7a2   : > { %3708 = vmatprep.subr.mxu0 %v4215_v44  ;;  %3622 = vmatmul.mubr.msk.f32.gmra.mxu0 %vm773_vm1, %v3190_v40  ;;  %v1719_v21 = vsel %vm773_vm1, %v4699_v55, -inf }
 0x7a3   : > { %1720 = vmax.xlane.f32.xlu0 %v1719_v21 }
 0x814   : > { %v1700_v16 = vpop.xlane.xlu1 %1699 }
 0x815   : > { %vm1722_vm6 = vcmp.ge.f32.partialorder %v4630_v31, %v1700_v16 }
 0x816   : > { %v1730_v50 = vsel %vm1722_vm6, %v4285_v0, 64.0 }
 0x817   : > { %v1738_v54 = vsel %vm773_vm1, %v1730_v50, inf }
 0x818   : > { %1739 = vmin.xlane.f32.xlu1 %v1738_v54  ;;  %v1706_v17 = vpop.xlane.xlu1 %1705 }
 0x819   : > { %vm1724_vm7 = vcmp.ge.f32.partialorder %v4637_v36, %v1706_v17 }
 0x81a   : > { %v1732_v56 = vsel %vm1724_vm7, %v4285_v0, 64.0 }
 0x81b   : > { %v1744_v53 = vsel %vm773_vm1, %v1732_v56, inf }
 0x81c   : > { %v1703_v20 = vpop.xlane.xlu0 %1702  ;;  %1745 = vmin.xlane.f32.xlu1 %v1744_v53 }
 0x81d   : > { %vm1723_vm8 = vcmp.ge.f32.partialorder %v4644_v38, %v1703_v20 }
 0x81e   : > { %v1731_v22 = vsel %vm1723_vm8, %v4285_v0, 64.0 }
 0x81f   : > { %v1741_v27 = vsel %vm773_vm1, %v1731_v22, inf }
 0x820   : > { %1742 = vmin.xlane.f32.xlu0 %v1741_v27  ;;  %v1709_v57 = vpop.xlane.xlu0 %1708 }
 0x821   : > { %vm1725_vm9 = vcmp.ge.f32.partialorder %v4656_v49, %v1709_v57 }
 0x822   : > { %v1733_v63 = vsel %vm1725_vm9, %v4285_v0, 64.0 }
 0x823   : > { %v1747_v30 = vsel %vm773_vm1, %v1733_v63, inf }
 0x824   : > { %1748 = vmin.xlane.f32.xlu0 %v1747_v30  ;;  %v1712_v5 = vpop.xlane.xlu1 %1711 }
 0x825   : > { %vm1726_vm10 = vcmp.ge.f32.partialorder %v4668_v58, %v1712_v5 }
 0x826   : > { %v1734_v32 = vsel %vm1726_vm10, %v4285_v0, 64.0 }
 0x827   : > { %v1750_v15 = vsel %vm773_vm1, %v1734_v32, inf }
 0x828   : > { %v1715_v33 = vpop.xlane.xlu0 %1714  ;;  %1751 = vmin.xlane.f32.xlu1 %v1750_v15 }
 0x829   : > { %vm1727_vm11 = vcmp.ge.f32.partialorder %v4680_v51, %v1715_v33  ;;  %v1718_v34 = vpop.xlane.xlu1 %1717 }
 0x82a   : > { %vm1728_vm12 = vcmp.ge.f32.partialorder %v4686_v1, %v1718_v34  ;;  %v1735_v35 = vsel %vm1727_vm11, %v4285_v0, 64.0 }
 0x82b   : > { %v1736_v37 = vsel %vm1728_vm12, %v4285_v0, 64.0  ;;  %v1753_v59 = vsel %vm773_vm1, %v1735_v35, inf }
 0x82c   : > { %1754 = vmin.xlane.f32.xlu0 %v1753_v59  ;;  %v1721_v19 = vpop.xlane.xlu0 %1720  ;;  %v1756_v47 = vsel %vm773_vm1, %v1736_v37, inf }
 0x82d   : > { %vm1729_vm13 = vcmp.ge.f32.partialorder %v4699_v55, %v1721_v19  ;;  %1757 = vmin.xlane.f32.xlu1 %v1756_v47 }
 0x82e   : > { %v1737_v26 = vsel %vm1729_vm13, %v4285_v0, 64.0 }
 0x82f   : > { %v1759_v52 = vsel %vm773_vm1, %v1737_v26, inf }
 0x830   : > { %1760 = vmin.xlane.f32.xlu0 %v1759_v52 }
 0x8a1   : > { %v1740_v28 = vpop.xlane.xlu1 %1739 }
 0x8a2   : > { %vm1762_vm14 = vcmp.eq.f32.partialorder %v4285_v0, %v1740_v28 }
 0x8a3   : > { %v3199_v29 = vsel %vm1762_vm14, 1.0, %v3949_v39  ;;  %v4734_v48 = vsel %vm1762_vm14, -inf, %v4630_v31 }
 0x8a4   : > { %3640 = vmatprep.mubr.msk.f32.mxu1 %vm773_vm1, %v3199_v29  ;;  %v1931_v11 = vsel %vm773_vm1, %v4734_v48, -inf }
 0x8a5   : > { %1932 = vmax.xlane.f32.xlu1 %v1931_v11  ;;  %v1746_v46 = vpop.xlane.xlu1 %1745 }
 0x8a6   : > { %vm1764_vm15 = vcmp.eq.f32.partialorder %v4285_v0, %v1746_v46 }
 0x8a7   : > { %v4741_v14 = vsel %vm1764_vm15, -inf, %v4637_v36  ;;  %v3201_v36 = vsel %vm1764_vm15, 1.0, %v3949_v39 }
 0x8a8   : > { %v1937_v60 = vsel %vm773_vm1, %v4741_v14, -inf }
 0x8a9   : > { %v1743_v18 = vpop.xlane.xlu0 %1742  ;;  %1938 = vmax.xlane.f32.xlu1 %v1937_v60 }
 0x8aa   : > { %vm1763_vm0 = vcmp.eq.f32.partialorder %v4285_v0, %v1743_v18 }
 0x8ab   : > { %v3200_v31 = vsel %vm1763_vm0, 1.0, %v3949_v39  ;;  %v4748_v62 = vsel %vm1763_vm0, -inf, %v4644_v38 }
 0x8ac   : > { %3641 = vmatmul.mubr.msk.f32.vlgmr.msra.gmra.mxu1 %vm773_vm1, %v3200_v31  ;;  %v1934_v2 = vsel %vm773_vm1, %v4748_v62, -inf }
 0x8ad   : > { %3681 = vmatpush3.msra.mxu1 %v4215_v44  ;;  %1935 = vmax.xlane.f32.xlu0 %v1934_v2  ;;  %v1749_v61 = vpop.xlane.xlu0 %1748 }
 0x8ae   : > { %vm1765_vm2 = vcmp.eq.f32.partialorder %v4285_v0, %v1749_v61  ;;  %3643 = vmatprep.mubr.msk.f32.mxu1 %vm773_vm1, %v3201_v36  ;;  %3682 = vmatprep.subr.mxu1 %v4210_v24 }
 0x8af   : > { %v3202_v38 = vsel %vm1765_vm2, 1.0, %v3949_v39  ;;  %v4760_v8 = vsel %vm1765_vm2, -inf, %v4656_v49  ;;  %3683 = vmatpush3.msra.mxu1 %v4210_v24 }
 0x8b0   : > { %3684 = vmatprep.subr.mxu1 %v4223_v45  ;;  %3644 = vmatmul.mubr.msk.f32.gmra.mxu1 %vm773_vm1, %v3202_v38  ;;  %v1940_v40 = vsel %vm773_vm1, %v4760_v8, -inf }
 0x8b1   : > { %3685 = vmatpush3.msra.mxu1 %v4223_v45  ;;  %1941 = vmax.xlane.f32.xlu0 %v1940_v40  ;;  %v1752_v21 = vpop.xlane.xlu1 %1751 }
 0x8b2   : > { %3686 = vmatprep.subr.mxu1 %v4212_v43  ;;  %vm1766_vm3 = vcmp.eq.f32.partialorder %v4285_v0, %v1752_v21 }
 0x8b3   : > { %v3203_v49 = vsel %vm1766_vm3, 1.0, %v3949_v39  ;;  %v4772_v16 = vsel %vm1766_vm3, -inf, %v4668_v58  ;;  %3687 = vmatpush3.msra.mxu1 %v4212_v43 }
 0x8b4   : > { %3688 = vmatprep.subr.mxu1 %v4204_v42  ;;  %3646 = vmatprep.mubr.msk.f32.mxu1 %vm773_vm1, %v3203_v49  ;;  %v1943_v50 = vsel %vm773_vm1, %v4772_v16, -inf }
 0x8b5   : > { %3689 = vmatpush3.msra.mxu1 %v4204_v42  ;;  %v1755_v54 = vpop.xlane.xlu0 %1754  ;;  %1944 = vmax.xlane.f32.xlu1 %v1943_v50 }
 0x8b6   : > { %vm1767_vm4 = vcmp.eq.f32.partialorder %v4285_v0, %v1755_v54  ;;  %3690 = vmatprep.subr.mxu1 %v4199_v25  ;;  %v1758_v17 = vpop.xlane.xlu1 %1757 }
 0x8b7   : > { %v3204_v58 = vsel %vm1767_vm4, 1.0, %v3949_v39  ;;  %v4784_v56 = vsel %vm1767_vm4, -inf, %v4680_v51  ;;  %vm1768_vm5 = vcmp.eq.f32.partialorder %v4285_v0, %v1758_v17  ;;  %3691 = vmatpush3.msra.mxu1 %v4199_v25 }
 0x8b8   : > { %v3205_v53 = vsel %vm1768_vm5, 1.0, %v3949_v39  ;;  %v4790_v20 = vsel %vm1768_vm5, -inf, %v4686_v1  ;;  %3692 = vmatprep.subr.mxu1 %v4208_v23  ;;  %3647 = vmatmul.mubr.msk.f32.gmra.mxu1 %vm773_vm1, %v3204_v58  ;;  %v1946_v22 = vsel %vm773_vm1, %v4784_v56, -inf }
 0x8b9   : > { %3693 = vmatpush3.msra.mxu1 %v4208_v23  ;;  %1947 = vmax.xlane.f32.xlu0 %v1946_v22  ;;  %v1761_v51 = vpop.xlane.xlu0 %1760  ;;  %v1949_v27 = vsel %vm773_vm1, %v4790_v20, -inf }
 0x8ba   : > { %vm1769_vm6 = vcmp.eq.f32.partialorder %v4285_v0, %v1761_v51  ;;  %3694 = vmatprep.subr.mxu1 %v4202_v41  ;;  %1950 = vmax.xlane.f32.xlu1 %v1949_v27 }
 0x8bb   : > { %v3206_v1 = vsel %vm1769_vm6, 1.0, %v3949_v39  ;;  %v4803_v57 = vsel %vm1769_vm6, -inf, %v4699_v55  ;;  %3649 = vmatprep.mubr.msk.f32.mxu1 %vm773_vm1, %v3205_v53  ;;  %3695 = vmatpush3.msra.mxu1 %v4202_v41 }
 0x8bc   : > { %3736 = vmatprep.subr.mxu1 %v4215_v44  ;;  %3650 = vmatmul.mubr.msk.f32.gmra.mxu1 %vm773_vm1, %v3206_v1  ;;  %v1952_v63 = vsel %vm773_vm1, %v4803_v57, -inf }
 0x8bd   : > { %1953 = vmax.xlane.f32.xlu0 %v1952_v63 }
 0x92e   : > { %v1933_v30 = vpop.xlane.xlu1 %1932 }
 0x92f   : > { %vm1955_vm7 = vcmp.ge.f32.partialorder %v4734_v48, %v1933_v30 }
 0x930   : > { %v1963_v5 = vsel %vm1955_vm7, %v4285_v0, 64.0 }
 0x931   : > { %v1971_v55 = vsel %vm773_vm1, %v1963_v5, inf }
 0x932   : > { %1972 = vmin.xlane.f32.xlu1 %v1971_v55  ;;  %v1939_v32 = vpop.xlane.xlu1 %1938 }
 0x933   : > { %vm1957_vm8 = vcmp.ge.f32.partialorder %v4741_v14, %v1939_v32 }
 0x934   : > { %v1965_v15 = vsel %vm1957_vm8, %v4285_v0, 64.0 }
 0x935   : > { %v1977_v33 = vsel %vm773_vm1, %v1965_v15, inf }
 0x936   : > { %v1936_v34 = vpop.xlane.xlu0 %1935  ;;  %1978 = vmin.xlane.f32.xlu1 %v1977_v33 }
 0x937   : > { %vm1956_vm9 = vcmp.ge.f32.partialorder %v4748_v62, %v1936_v34 }
 0x938   : > { %v1964_v35 = vsel %vm1956_vm9, %v4285_v0, 64.0 }
 0x939   : > { %v1974_v37 = vsel %vm773_vm1, %v1964_v35, inf }
 0x93a   : > { %1975 = vmin.xlane.f32.xlu0 %v1974_v37  ;;  %v1942_v59 = vpop.xlane.xlu0 %1941 }
 0x93b   : > { %vm1958_vm10 = vcmp.ge.f32.partialorder %v4760_v8, %v1942_v59 }
 0x93c   : > { %v1966_v19 = vsel %vm1958_vm10, %v4285_v0, 64.0 }
 0x93d   : > { %v1980_v47 = vsel %vm773_vm1, %v1966_v19, inf }
 0x93e   : > { %1981 = vmin.xlane.f32.xlu0 %v1980_v47  ;;  %v1945_v26 = vpop.xlane.xlu1 %1944 }
 0x93f   : > { %vm1959_vm11 = vcmp.ge.f32.partialorder %v4772_v16, %v1945_v26 }
 0x940   : > { %v1967_v52 = vsel %vm1959_vm11, %v4285_v0, 64.0 }
 0x941   : > { %v1983_v28 = vsel %vm773_vm1, %v1967_v52, inf }
 0x942   : > { %v1948_v29 = vpop.xlane.xlu0 %1947  ;;  %1984 = vmin.xlane.f32.xlu1 %v1983_v28 }
 0x943   : > { %vm1960_vm12 = vcmp.ge.f32.partialorder %v4784_v56, %v1948_v29  ;;  %v1951_v11 = vpop.xlane.xlu1 %1950 }
 0x944   : > { %v1968_v46 = vsel %vm1960_vm12, %v4285_v0, 64.0  ;;  %vm1961_vm13 = vcmp.ge.f32.partialorder %v4790_v20, %v1951_v11 }
 0x945   : > { %v1969_v60 = vsel %vm1961_vm13, %v4285_v0, 64.0  ;;  %v1986_v18 = vsel %vm773_vm1, %v1968_v46, inf }
 0x946   : > { %1987 = vmin.xlane.f32.xlu0 %v1986_v18  ;;  %v1954_v31 = vpop.xlane.xlu0 %1953  ;;  %v1989_v2 = vsel %vm773_vm1, %v1969_v60, inf }
 0x947   : > { %vm1962_vm14 = vcmp.ge.f32.partialorder %v4803_v57, %v1954_v31  ;;  %1990 = vmin.xlane.f32.xlu1 %v1989_v2 }
 0x948   : > { %v1970_v36 = vsel %vm1962_vm14, %v4285_v0, 64.0 }
 0x949   : > { %v1992_v61 = vsel %vm773_vm1, %v1970_v36, inf }
 0x94a   : > { %1993 = vmin.xlane.f32.xlu0 %v1992_v61 }
 0x9bb   : > { %v1973_v38 = vpop.xlane.xlu1 %1972 }
 0x9bc   : > { %vm1995_vm15 = vcmp.eq.f32.partialorder %v4285_v0, %v1973_v38 }
 0x9bd   : > { %v3215_v40 = vsel %vm1995_vm15, 1.0, %v3949_v39  ;;  %v4838_v21 = vsel %vm1995_vm15, -inf, %v4734_v48 }
 0x9be   : > { %3668 = vmatprep.mubr.msk.f32.mxu0 %vm773_vm1, %v3215_v40  ;;  %v2164_v49 = vsel %vm773_vm1, %v4838_v21, -inf }
 0x9bf   : > { %2165 = vmax.xlane.f32.xlu1 %v2164_v49  ;;  %v1979_v50 = vpop.xlane.xlu1 %1978 }
 0x9c0   : > { %vm1997_vm0 = vcmp.eq.f32.partialorder %v4285_v0, %v1979_v50 }
 0x9c1   : > { %v4845_v54 = vsel %vm1997_vm0, -inf, %v4741_v14  ;;  %v3217_v14 = vsel %vm1997_vm0, 1.0, %v3949_v39 }
 0x9c2   : > { %v2170_v17 = vsel %vm773_vm1, %v4845_v54, -inf }
 0x9c3   : > { %v1976_v58 = vpop.xlane.xlu0 %1975  ;;  %2171 = vmax.xlane.f32.xlu1 %v2170_v17 }
 0x9c4   : > { %vm1996_vm2 = vcmp.eq.f32.partialorder %v4285_v0, %v1976_v58 }
 0x9c5   : > { %v3216_v48 = vsel %vm1996_vm2, 1.0, %v3949_v39  ;;  %v4852_v53 = vsel %vm1996_vm2, -inf, %v4748_v62 }
 0x9c6   : > { %3669 = vmatmul.mubr.msk.f32.vlgmr.msra.gmra.mxu0 %vm773_vm1, %v3216_v48  ;;  %v2167_v22 = vsel %vm773_vm1, %v4852_v53, -inf }
 0x9c7   : > { %3709 = vmatpush3.msra.mxu0 %v4215_v44  ;;  %2168 = vmax.xlane.f32.xlu0 %v2167_v22  ;;  %v1982_v51 = vpop.xlane.xlu0 %1981 }
 0x9c8   : > { %vm1998_vm3 = vcmp.eq.f32.partialorder %v4285_v0, %v1982_v51  ;;  %3671 = vmatprep.mubr.msk.f32.mxu0 %vm773_vm1, %v3217_v14  ;;  %3710 = vmatprep.subr.mxu0 %v4210_v24 }
 0x9c9   : > { %v3218_v62 = vsel %vm1998_vm3, 1.0, %v3949_v39  ;;  %v4864_v27 = vsel %vm1998_vm3, -inf, %v4760_v8  ;;  %3711 = vmatpush3.msra.mxu0 %v4210_v24 }
 0x9ca   : > { %3712 = vmatprep.subr.mxu0 %v4223_v45  ;;  %3672 = vmatmul.mubr.msk.f32.gmra.mxu0 %vm773_vm1, %v3218_v62  ;;  %v2173_v1 = vsel %vm773_vm1, %v4864_v27, -inf }
 0x9cb   : > { %3713 = vmatpush3.msra.mxu0 %v4223_v45  ;;  %2174 = vmax.xlane.f32.xlu0 %v2173_v1  ;;  %v1985_v63 = vpop.xlane.xlu1 %1984 }
 0x9cc   : > { %3714 = vmatprep.subr.mxu0 %v4212_v43  ;;  %vm1999_vm4 = vcmp.eq.f32.partialorder %v4285_v0, %v1985_v63 }
 0x9cd   : > { %v3219_v8 = vsel %vm1999_vm4, 1.0, %v3949_v39  ;;  %v4876_v30 = vsel %vm1999_vm4, -inf, %v4772_v16  ;;  %3715 = vmatpush3.msra.mxu0 %v4212_v43 }
 0x9ce   : > { %3716 = vmatprep.subr.mxu0 %v4204_v42  ;;  %3674 = vmatprep.mubr.msk.f32.mxu0 %vm773_vm1, %v3219_v8  ;;  %v2176_v5 = vsel %vm773_vm1, %v4876_v30, -inf }
 0x9cf   : > { %3717 = vmatpush3.msra.mxu0 %v4204_v42  ;;  %v1988_v55 = vpop.xlane.xlu0 %1987  ;;  %2177 = vmax.xlane.f32.xlu1 %v2176_v5 }
 0x9d0   : > { %vm2000_vm5 = vcmp.eq.f32.partialorder %v4285_v0, %v1988_v55  ;;  %3718 = vmatprep.subr.mxu0 %v4199_v25  ;;  %v1991_v32 = vpop.xlane.xlu1 %1990 }
 0x9d1   : > { %v3220_v16 = vsel %vm2000_vm5, 1.0, %v3949_v39  ;;  %v4888_v15 = vsel %vm2000_vm5, -inf, %v4784_v56  ;;  %vm2001_vm6 = vcmp.eq.f32.partialorder %v4285_v0, %v1991_v32  ;;  %3719 = vmatpush3.msra.mxu0 %v4199_v25 }
 0x9d2   : > { %v3221_v33 = vsel %vm2001_vm6, 1.0, %v3949_v39  ;;  %v4894_v34 = vsel %vm2001_vm6, -inf, %v4790_v20  ;;  %3720 = vmatprep.subr.mxu0 %v4208_v23  ;;  %3675 = vmatmul.mubr.msk.f32.gmra.mxu0 %vm773_vm1, %v3220_v16  ;;  %v2179_v35 = vsel %vm773_vm1, %v4888_v15, -inf }
 0x9d3   : > { %3721 = vmatpush3.msra.mxu0 %v4208_v23  ;;  %2180 = vmax.xlane.f32.xlu0 %v2179_v35  ;;  %v1994_v56 = vpop.xlane.xlu0 %1993  ;;  %v2182_v37 = vsel %vm773_vm1, %v4894_v34, -inf }
 0x9d4   : > { %vm2002_vm7 = vcmp.eq.f32.partialorder %v4285_v0, %v1994_v56  ;;  %3722 = vmatprep.subr.mxu0 %v4202_v41  ;;  %2183 = vmax.xlane.f32.xlu1 %v2182_v37 }
 0x9d5   : > { %v3222_v20 = vsel %vm2002_vm7, 1.0, %v3949_v39  ;;  %v4907_v59 = vsel %vm2002_vm7, -inf, %v4803_v57  ;;  %3677 = vmatprep.mubr.msk.f32.mxu0 %vm773_vm1, %v3221_v33  ;;  %3723 = vmatpush3.msra.mxu0 %v4202_v41 }
 0x9d6   : > { %3678 = vmatmul.mubr.msk.f32.gmra.mxu0 %vm773_vm1, %v3222_v20  ;;  %v2185_v19 = vsel %vm773_vm1, %v4907_v59, -inf }
 0x9d7   : > { %2186 = vmax.xlane.f32.xlu0 %v2185_v19 }
 0xa48   : > { %v2166_v47 = vpop.xlane.xlu1 %2165 }
 0xa49   : > { %vm2188_vm8 = vcmp.ge.f32.partialorder %v4838_v21, %v2166_v47 }
 0xa4a   : > { %v2196_v26 = vsel %vm2188_vm8, %v4285_v0, 64.0 }
 0xa4b   : > { %v2204_v52 = vsel %vm773_vm1, %v2196_v26, inf }
 0xa4c   : > { %2205 = vmin.xlane.f32.xlu1 %v2204_v52  ;;  %v2172_v57 = vpop.xlane.xlu1 %2171 }
 0xa4d   : > { %vm2190_vm9 = vcmp.ge.f32.partialorder %v4845_v54, %v2172_v57 }
 0xa4e   : > { %v2198_v28 = vsel %vm2190_vm9, %v4285_v0, 64.0 }
 0xa4f   : > { %v2210_v29 = vsel %vm773_vm1, %v2198_v28, inf }
 0xa50   : > { %v2169_v11 = vpop.xlane.xlu0 %2168  ;;  %2211 = vmin.xlane.f32.xlu1 %v2210_v29 }
 0xa51   : > { %vm2189_vm10 = vcmp.ge.f32.partialorder %v4852_v53, %v2169_v11 }
 0xa52   : > { %v2197_v46 = vsel %vm2189_vm10, %v4285_v0, 64.0 }
 0xa53   : > { %v2207_v60 = vsel %vm773_vm1, %v2197_v46, inf }
 0xa54   : > { %2208 = vmin.xlane.f32.xlu0 %v2207_v60  ;;  %v2175_v18 = vpop.xlane.xlu0 %2174 }
 0xa55   : > { %vm2191_vm11 = vcmp.ge.f32.partialorder %v4864_v27, %v2175_v18 }
 0xa56   : > { %v2199_v31 = vsel %vm2191_vm11, %v4285_v0, 64.0 }
 0xa57   : > { %v2213_v2 = vsel %vm773_vm1, %v2199_v31, inf }
 0xa58   : > { %2214 = vmin.xlane.f32.xlu0 %v2213_v2  ;;  %v2178_v36 = vpop.xlane.xlu1 %2177 }
 0xa59   : > { %vm2192_vm12 = vcmp.ge.f32.partialorder %v4876_v30, %v2178_v36 }
 0xa5a   : > { %v2200_v61 = vsel %vm2192_vm12, %v4285_v0, 64.0 }
 0xa5b   : > { %v2216_v38 = vsel %vm773_vm1, %v2200_v61, inf }
 0xa5c   : > { %v2181_v40 = vpop.xlane.xlu0 %2180  ;;  %2217 = vmin.xlane.f32.xlu1 %v2216_v38 }
 0xa5d   : > { %vm2193_vm13 = vcmp.ge.f32.partialorder %v4888_v15, %v2181_v40  ;;  %v2184_v49 = vpop.xlane.xlu1 %2183 }
 0xa5e   : > { %v2201_v50 = vsel %vm2193_vm13, %v4285_v0, 64.0  ;;  %vm2194_vm14 = vcmp.ge.f32.partialorder %v4894_v34, %v2184_v49 }
 0xa5f   : > { %v2202_v17 = vsel %vm2194_vm14, %v4285_v0, 64.0  ;;  %v2219_v58 = vsel %vm773_vm1, %v2201_v50, inf }
 0xa60   : > { %2220 = vmin.xlane.f32.xlu0 %v2219_v58  ;;  %v2187_v48 = vpop.xlane.xlu0 %2186  ;;  %v2222_v22 = vsel %vm773_vm1, %v2202_v17, inf }
 0xa61   : > { %vm2195_vm15 = vcmp.ge.f32.partialorder %v4907_v59, %v2187_v48  ;;  %2223 = vmin.xlane.f32.xlu1 %v2222_v22 }
 0xa62   : > { %v2203_v14 = vsel %vm2195_vm15, %v4285_v0, 64.0 }
 0xa63   : > { %v2225_v51 = vsel %vm773_vm1, %v2203_v14, inf }
 0xa64   : > { %2226 = vmin.xlane.f32.xlu0 %v2225_v51 }
 0xad5   : > { %v2206_v62 = vpop.xlane.xlu1 %2205 }
 0xad6   : > { %vm2228_vm0 = vcmp.eq.f32.partialorder %v4285_v0, %v2206_v62 }
 0xad7   : > { %v3231_v1 = vsel %vm2228_vm0, 1.0, %v3949_v39  ;;  %v4941_v63 = vsel %vm2228_vm0, -inf, %v4838_v21 }
 0xad8   : > { %3696 = vmatprep.mubr.msk.f32.mxu1 %vm773_vm1, %v3231_v1  ;;  %v2397_v8 = vsel %vm773_vm1, %v4941_v63, -inf }
 0xad9   : > { %2398 = vmax.xlane.f32.xlu1 %v2397_v8  ;;  %v2212_v5 = vpop.xlane.xlu1 %2211 }
 0xada   : > { %vm2230_vm2 = vcmp.eq.f32.partialorder %v4285_v0, %v2212_v5 }
 0xadb   : > { %v4948_v55 = vsel %vm2230_vm2, -inf, %v4845_v54  ;;  %v3233_v54 = vsel %vm2230_vm2, 1.0, %v3949_v39 }
 0xadc   : > { %v2403_v32 = vsel %vm773_vm1, %v4948_v55, -inf }
 0xadd   : > { %v2209_v16 = vpop.xlane.xlu0 %2208  ;;  %2404 = vmax.xlane.f32.xlu1 %v2403_v32 }
 0xade   : > { %vm2229_vm3 = vcmp.eq.f32.partialorder %v4285_v0, %v2209_v16 }
 0xadf   : > { %v3232_v21 = vsel %vm2229_vm3, 1.0, %v3949_v39  ;;  %v4955_v33 = vsel %vm2229_vm3, -inf, %v4852_v53 }
 0xae0   : > { %3697 = vmatmul.mubr.msk.f32.vlgmr.msra.gmra.mxu1 %vm773_vm1, %v3232_v21  ;;  %v2400_v35 = vsel %vm773_vm1, %v4955_v33, -inf }
 0xae1   : > { %3737 = vmatpush3.msra.mxu1 %v4215_v44  ;;  %2401 = vmax.xlane.f32.xlu0 %v2400_v35  ;;  %v2215_v56 = vpop.xlane.xlu0 %2214 }
 0xae2   : > { %vm2231_vm4 = vcmp.eq.f32.partialorder %v4285_v0, %v2215_v56  ;;  %3699 = vmatprep.mubr.msk.f32.mxu1 %vm773_vm1, %v3233_v54  ;;  %3738 = vmatprep.subr.mxu1 %v4210_v24 }
 0xae3   : > { %v3234_v53 = vsel %vm2231_vm4, 1.0, %v3949_v39  ;;  %v4967_v37 = vsel %vm2231_vm4, -inf, %v4864_v27  ;;  %3739 = vmatpush3.msra.mxu1 %v4210_v24 }
 0xae4   : > { %3740 = vmatprep.subr.mxu1 %v4223_v45  ;;  %3700 = vmatmul.mubr.msk.f32.gmra.mxu1 %vm773_vm1, %v3234_v53  ;;  %v2406_v20 = vsel %vm773_vm1, %v4967_v37, -inf }
 0xae5   : > { %3741 = vmatpush3.msra.mxu1 %v4223_v45  ;;  %2407 = vmax.xlane.f32.xlu0 %v2406_v20  ;;  %v2218_v19 = vpop.xlane.xlu1 %2217 }
 0xae6   : > { %3742 = vmatprep.subr.mxu1 %v4212_v43  ;;  %vm2232_vm5 = vcmp.eq.f32.partialorder %v4285_v0, %v2218_v19 }
 0xae7   : > { %v3235_v27 = vsel %vm2232_vm5, 1.0, %v3949_v39  ;;  %v4979_v47 = vsel %vm2232_vm5, -inf, %v4876_v30  ;;  %3743 = vmatpush3.msra.mxu1 %v4212_v43 }
 0xae8   : > { %3744 = vmatprep.subr.mxu1 %v4204_v42  ;;  %3702 = vmatprep.mubr.msk.f32.mxu1 %vm773_vm1, %v3235_v27  ;;  %v2409_v26 = vsel %vm773_vm1, %v4979_v47, -inf }
 0xae9   : > { %3745 = vmatpush3.msra.mxu1 %v4204_v42  ;;  %v2221_v52 = vpop.xlane.xlu0 %2220  ;;  %2410 = vmax.xlane.f32.xlu1 %v2409_v26 }
 0xaea   : > { %vm2233_vm6 = vcmp.eq.f32.partialorder %v4285_v0, %v2221_v52  ;;  %3746 = vmatprep.subr.mxu1 %v4199_v25  ;;  %v2224_v57 = vpop.xlane.xlu1 %2223 }
 0xaeb   : > { %v3236_v30 = vsel %vm2233_vm6, 1.0, %v3949_v39  ;;  %v4991_v28 = vsel %vm2233_vm6, -inf, %v4888_v15  ;;  %vm2234_vm7 = vcmp.eq.f32.partialorder %v4285_v0, %v2224_v57  ;;  %3747 = vmatpush3.msra.mxu1 %v4199_v25 }
 0xaec   : > { %v3237_v29 = vsel %vm2234_vm7, 1.0, %v3949_v39  ;;  %v4997_v11 = vsel %vm2234_vm7, -inf, %v4894_v34  ;;  %3748 = vmatprep.subr.mxu1 %v4208_v23  ;;  %3703 = vmatmul.mubr.msk.f32.gmra.mxu1 %vm773_vm1, %v3236_v30  ;;  %v2412_v46 = vsel %vm773_vm1, %v4991_v28, -inf }
 0xaed   : > { %3749 = vmatpush3.msra.mxu1 %v4208_v23  ;;  %2413 = vmax.xlane.f32.xlu0 %v2412_v46  ;;  %v2227_v15 = vpop.xlane.xlu0 %2226  ;;  %v2415_v60 = vsel %vm773_vm1, %v4997_v11, -inf }
 0xaee   : > { %vm2235_vm8 = vcmp.eq.f32.partialorder %v4285_v0, %v2227_v15  ;;  %3750 = vmatprep.subr.mxu1 %v4202_v41  ;;  %2416 = vmax.xlane.f32.xlu1 %v2415_v60 }
 0xaef   : > { %v3238_v34 = vsel %vm2235_vm8, 1.0, %v3949_v39  ;;  %v5010_v18 = vsel %vm2235_vm8, -inf, %v4907_v59  ;;  %3705 = vmatprep.mubr.msk.f32.mxu1 %vm773_vm1, %v3237_v29  ;;  %3751 = vmatpush3.msra.mxu1 %v4202_v41 }
 0xaf0   : > { %3706 = vmatmul.mubr.msk.f32.gmra.mxu1 %vm773_vm1, %v3238_v34  ;;  %v2418_v31 = vsel %vm773_vm1, %v5010_v18, -inf }
 0xaf1   : > { %2419 = vmax.xlane.f32.xlu0 %v2418_v31 }
 0xb62   : > { %v2399_v2 = vpop.xlane.xlu1 %2398 }
 0xb63   : > { %vm2421_vm9 = vcmp.ge.f32.partialorder %v4941_v63, %v2399_v2 }
 0xb64   : > { %v2429_v36 = vsel %vm2421_vm9, %v4285_v0, 64.0 }
 0xb65   : > { %v2437_v61 = vsel %vm773_vm1, %v2429_v36, inf }
 0xb66   : > { %2438 = vmin.xlane.f32.xlu1 %v2437_v61  ;;  %v2405_v59 = vpop.xlane.xlu1 %2404 }
 0xb67   : > { %vm2423_vm10 = vcmp.ge.f32.partialorder %v4948_v55, %v2405_v59 }
 0xb68   : > { %v2431_v38 = vsel %vm2423_vm10, %v4285_v0, 64.0 }
 0xb69   : > { %v2443_v40 = vsel %vm773_vm1, %v2431_v38, inf }
 0xb6a   : > { %v2402_v49 = vpop.xlane.xlu0 %2401  ;;  %2444 = vmin.xlane.f32.xlu1 %v2443_v40 }
 0xb6b   : > { %vm2422_vm11 = vcmp.ge.f32.partialorder %v4955_v33, %v2402_v49 }
 0xb6c   : > { %v2430_v50 = vsel %vm2422_vm11, %v4285_v0, 64.0 }
 0xb6d   : > { %v2440_v17 = vsel %vm773_vm1, %v2430_v50, inf }
 0xb6e   : > { %2441 = vmin.xlane.f32.xlu0 %v2440_v17  ;;  %v2408_v58 = vpop.xlane.xlu0 %2407 }
 0xb6f   : > { %vm2424_vm12 = vcmp.ge.f32.partialorder %v4967_v37, %v2408_v58 }
 0xb70   : > { %v2432_v48 = vsel %vm2424_vm12, %v4285_v0, 64.0 }
 0xb71   : > { %v2446_v22 = vsel %vm773_vm1, %v2432_v48, inf }
 0xb72   : > { %2447 = vmin.xlane.f32.xlu0 %v2446_v22  ;;  %v2411_v14 = vpop.xlane.xlu1 %2410 }
 0xb73   : > { %vm2425_vm13 = vcmp.ge.f32.partialorder %v4979_v47, %v2411_v14 }
 0xb74   : > { %v2433_v51 = vsel %vm2425_vm13, %v4285_v0, 64.0 }
 0xb75   : > { %v2449_v62 = vsel %vm773_vm1, %v2433_v51, inf }
 0xb76   : > { %v2414_v1 = vpop.xlane.xlu0 %2413  ;;  %2450 = vmin.xlane.f32.xlu1 %v2449_v62 }
 0xb77   : > { %vm2426_vm14 = vcmp.ge.f32.partialorder %v4991_v28, %v2414_v1  ;;  %v2417_v8 = vpop.xlane.xlu1 %2416 }
 0xb78   : > { %v2434_v5 = vsel %vm2426_vm14, %v4285_v0, 64.0  ;;  %vm2427_vm15 = vcmp.ge.f32.partialorder %v4997_v11, %v2417_v8 }
 0xb79   : > { %v2435_v32 = vsel %vm2427_vm15, %v4285_v0, 64.0  ;;  %v2452_v16 = vsel %vm773_vm1, %v2434_v5, inf }
 0xb7a   : > { %2453 = vmin.xlane.f32.xlu0 %v2452_v16  ;;  %v2420_v21 = vpop.xlane.xlu0 %2419  ;;  %v2455_v35 = vsel %vm773_vm1, %v2435_v32, inf }
 0xb7b   : > { %vm2428_vm0 = vcmp.ge.f32.partialorder %v5010_v18, %v2420_v21  ;;  %2456 = vmin.xlane.f32.xlu1 %v2455_v35 }
 0xb7c   : > { %v2436_v54 = vsel %vm2428_vm0, %v4285_v0, 64.0 }
 0xb7d   : > { %v2458_v56 = vsel %vm773_vm1, %v2436_v54, inf }
 0xb7e   : > { %2459 = vmin.xlane.f32.xlu0 %v2458_v56 }
 0xbef   : > { %v2439_v53 = vpop.xlane.xlu1 %2438 }
 0xbf0   : > { %vm2461_vm2 = vcmp.eq.f32.partialorder %v4285_v0, %v2439_v53 }
 0xbf1   : > { %v3247_v20 = vsel %vm2461_vm2, 1.0, %v3949_v39  ;;  %v2622_v19 = vsel %vm2461_vm2, -inf, %v4941_v63 }
 0xbf2   : > { %3724 = vmatprep.mubr.msk.f32.mxu0 %vm773_vm1, %v3247_v20  ;;  %v2630_v27 = vsel %vm773_vm1, %v2622_v19, -inf }
 0xbf3   : > { %2631 = vmax.xlane.f32.xlu1 %v2630_v27  ;;  %v2445_v26 = vpop.xlane.xlu1 %2444 }
 0xbf4   : > { %vm2463_vm3 = vcmp.eq.f32.partialorder %v4285_v0, %v2445_v26 }
 0xbf5   : > { %v2624_v52 = vsel %vm2463_vm3, -inf, %v4948_v55  ;;  %v3249_v46 = vsel %vm2463_vm3, 1.0, %v3949_v39 }
 0xbf6   : > { %v2636_v57 = vsel %vm773_vm1, %v2624_v52, -inf }
 0xbf7   : > { %v2442_v30 = vpop.xlane.xlu0 %2441  ;;  %2637 = vmax.xlane.f32.xlu1 %v2636_v57 }
 0xbf8   : > { %vm2462_vm4 = vcmp.eq.f32.partialorder %v4285_v0, %v2442_v30 }
 0xbf9   : > { %v3248_v29 = vsel %vm2462_vm4, 1.0, %v3949_v39  ;;  %v2623_v63 = vsel %vm2462_vm4, -inf, %v4955_v33 }
 0xbfa   : > { %3725 = vmatmul.mubr.msk.f32.vlgmr.msra.gmra.mxu0 %vm773_vm1, %v3248_v29  ;;  %v2633_v15 = vsel %vm773_vm1, %v2623_v63, -inf }
 0xbfb   : > { %2634 = vmax.xlane.f32.xlu0 %v2633_v15  ;;  %v2448_v60 = vpop.xlane.xlu0 %2447  ;;  %3727 = vmatprep.mubr.msk.f32.mxu0 %vm773_vm1, %v3249_v46  ;;  %v3834_v46 = vld [vmem:[%s5342_s6 + $0x8] sm:$0xff]  }
 0xbfc   : > { %vm2464_vm5 = vcmp.eq.f32.partialorder %v4285_v0, %v2448_v60  ;;  %3764 = vmatprep.subr.bf16.mxu0 %v3834_v46 }
 0xbfd   : > { %v3250_v55 = vsel %vm2464_vm5, 1.0, %v3949_v39  ;;  %v2625_v34 = vsel %vm2464_vm5, -inf, %v4967_v37  ;;  %3765 = vmatpush3.bf16.msra.mxu0 %v3834_v46 }
 0xbfe   : > { %3728 = vmatmul.mubr.msk.f32.gmra.mxu0 %vm773_vm1, %v3250_v55  ;;  %v2639_v33 = vsel %vm773_vm1, %v2625_v34, -inf }
 0xbff   : > { %2640 = vmax.xlane.f32.xlu0 %v2639_v33  ;;  %v2451_v31 = vpop.xlane.xlu1 %2450 }
 0xc00   : > { %vm2465_vm6 = vcmp.eq.f32.partialorder %v4285_v0, %v2451_v31 }
 0xc01   : > { %v3251_v2 = vsel %vm2465_vm6, 1.0, %v3949_v39  ;;  %v2626_v36 = vsel %vm2465_vm6, -inf, %v4979_v47 }
 0xc02   : > { %3730 = vmatprep.mubr.msk.f32.mxu0 %vm773_vm1, %v3251_v2  ;;  %v2642_v61 = vsel %vm773_vm1, %v2626_v36, -inf }
 0xc03   : > { %v2454_v59 = vpop.xlane.xlu0 %2453  ;;  %2643 = vmax.xlane.f32.xlu1 %v2642_v61 }
 0xc04   : > { %vm2466_vm7 = vcmp.eq.f32.partialorder %v4285_v0, %v2454_v59  ;;  %v2457_v37 = vpop.xlane.xlu1 %2456 }
 0xc05   : > { %v3252_v38 = vsel %vm2466_vm7, 1.0, %v3949_v39  ;;  %v2627_v40 = vsel %vm2466_vm7, -inf, %v4991_v28  ;;  %vm2467_vm8 = vcmp.eq.f32.partialorder %v4285_v0, %v2457_v37 }
 0xc06   : > { %v3253_v49 = vsel %vm2467_vm8, 1.0, %v3949_v39  ;;  %v2628_v50 = vsel %vm2467_vm8, -inf, %v4997_v11  ;;  %3731 = vmatmul.mubr.msk.f32.gmra.mxu0 %vm773_vm1, %v3252_v38  ;;  %v2645_v47 = vsel %vm773_vm1, %v2627_v40, -inf }
 0xc07   : > { %2646 = vmax.xlane.f32.xlu0 %v2645_v47  ;;  %v2460_v17 = vpop.xlane.xlu0 %2459  ;;  %v2648_v58 = vsel %vm773_vm1, %v2628_v50, -inf  ;;  %3733 = vmatprep.mubr.msk.f32.mxu0 %vm773_vm1, %v3253_v49 }
 0xc08   : > { %vm2468_vm9 = vcmp.eq.f32.partialorder %v4285_v0, %v2460_v17  ;;  %2649 = vmax.xlane.f32.xlu1 %v2648_v58  ;;  %v5124_v17 = vpop.f32.mrf.mxu0 }
 0xc09   : > { %v3254_v28 = vsel %vm2468_vm9, 1.0, %v3949_v39  ;;  %v2629_v48 = vsel %vm2468_vm9, -inf, %v5010_v18 }
 0xc0a   : > { %3734 = vmatmul.mubr.msk.f32.gmra.mxu0 %vm773_vm1, %v3254_v28  ;;  %v2651_v11 = vsel %vm773_vm1, %v2629_v48, -inf  ;;  %v5126_v58 = vpop.f32.mrf.mxu0 }
 0xc0b   : > { %2652 = vmax.xlane.f32.xlu0 %v2651_v11 }
 0xc0c   : > { %v5128_v28 = vpop.f32.mrf.mxu0 }
 0xc0e   : > { %v5133_v11 = vpop.f32.mrf.mxu0 }
 0xc7c   : > { %v2632_v22 = vpop.xlane.xlu1 %2631 }
 0xc7d   : > { %vm2654_vm10 = vcmp.ge.f32.partialorder %v2622_v19, %v2632_v22  ;;  %v3530_v22 = vpop.f32.mrf.mxu1 }
 0xc7e   : > { %v2662_v14 = vsel %vm2654_vm10, %v4285_v0, 64.0 }
 0xc7f   : > { %v2670_v51 = vsel %vm773_vm1, %v2662_v14, inf }
 0xc80   : > { %2671 = vmin.xlane.f32.xlu1 %v2670_v51  ;;  %v2638_v62 = vpop.xlane.xlu1 %2637 }
 0xc81   : > { %vm2656_vm11 = vcmp.ge.f32.partialorder %v2624_v52, %v2638_v62 }
 0xc82   : > { %v2664_v1 = vsel %vm2656_vm11, %v4285_v0, 64.0  ;;  %vm2898_vm11 = vcmask 261120  }
 0xc83   : > { %v2676_v8 = vsel %vm773_vm1, %v2664_v1, inf }
 0xc84   : > { %v2635_v5 = vpop.xlane.xlu0 %2634  ;;  %2677 = vmin.xlane.f32.xlu1 %v2676_v8 }
 0xc85   : > { %vm2655_vm12 = vcmp.ge.f32.partialorder %v2623_v63, %v2635_v5 }
 0xc86   : > { %v2663_v18 = vsel %vm2655_vm12, %v4285_v0, 64.0 }
 0xc87   : > { %v2673_v32 = vsel %vm773_vm1, %v2663_v18, inf }
 0xc88   : > { %2674 = vmin.xlane.f32.xlu0 %v2673_v32  ;;  %v2641_v16 = vpop.xlane.xlu0 %2640 }
 0xc89   : > { %vm2657_vm13 = vcmp.ge.f32.partialorder %v2625_v34, %v2641_v16 }
 0xc8a   : > { %v2665_v21 = vsel %vm2657_vm13, %v4285_v0, 64.0 }
 0xc8b   : > { %v2679_v35 = vsel %vm773_vm1, %v2665_v21, inf }
 0xc8c   : > { %2680 = vmin.xlane.f32.xlu0 %v2679_v35  ;;  %v2644_v54 = vpop.xlane.xlu1 %2643 }
 0xc8d   : > { %vm2658_vm14 = vcmp.ge.f32.partialorder %v2626_v36, %v2644_v54 }
 0xc8e   : > { %v2666_v56 = vsel %vm2658_vm14, %v4285_v0, 64.0 }
 0xc8f   : > { %v2682_v53 = vsel %vm773_vm1, %v2666_v56, inf }
 0xc90   : > { %v2647_v20 = vpop.xlane.xlu0 %2646  ;;  %2683 = vmin.xlane.f32.xlu1 %v2682_v53 }
 0xc91   : > { %vm2659_vm15 = vcmp.ge.f32.partialorder %v2627_v40, %v2647_v20  ;;  %v2650_v19 = vpop.xlane.xlu1 %2649 }
 0xc92   : > { %v2667_v27 = vsel %vm2659_vm15, %v4285_v0, 64.0  ;;  %vm2660_vm0 = vcmp.ge.f32.partialorder %v2628_v50, %v2650_v19 }
 0xc93   : > { %v2668_v26 = vsel %vm2660_vm0, %v4285_v0, 64.0  ;;  %v2685_v52 = vsel %vm773_vm1, %v2667_v27, inf }
 0xc94   : > { %2686 = vmin.xlane.f32.xlu0 %v2685_v52  ;;  %v2653_v57 = vpop.xlane.xlu0 %2652  ;;  %v2688_v30 = vsel %vm773_vm1, %v2668_v26, inf }
 0xc95   : > { %vm2661_vm2 = vcmp.ge.f32.partialorder %v2629_v48, %v2653_v57  ;;  %2689 = vmin.xlane.f32.xlu1 %v2688_v30  ;;  %v3835_v48 = vld [vmem:[%s5342_s6] sm:$0xff]  }
 0xc96   : > { %v2669_v29 = vsel %vm2661_vm2, %v4285_v0, 64.0  ;;  %3766 = vmatprep.subr.bf16.mxu0 %v3835_v48 }
 0xc97   : > { %v2691_v63 = vsel %vm773_vm1, %v2669_v29, inf  ;;  %3767 = vmatpush3.bf16.msra.mxu0 %v3835_v48 }
 0xc98   : > { %2692 = vmin.xlane.f32.xlu0 %v2691_v63 }
 0xd09   : > { %v2672_v15 = vpop.xlane.xlu1 %2671 }
 0xd0a   : > { %vm2694_vm3 = vcmp.eq.f32.partialorder %v4285_v0, %v2672_v15 }
 0xd0b   : > { %v3263_v60 = vsel %vm2694_vm3, 1.0, %v3949_v39 }
 0xd0c   : > { %3752 = vmatprep.mubr.msk.f32.mxu1 %vm773_vm1, %v3263_v60 }
 0xd0d   : > { %v2678_v55 = vpop.xlane.xlu1 %2677 }
 0xd0e   : > { %vm2696_vm4 = vcmp.eq.f32.partialorder %v4285_v0, %v2678_v55 }
 0xd0f   : > { %v3265_v31 = vsel %vm2696_vm4, 1.0, %v3949_v39 }
 0xd11   : > { %v2675_v34 = vpop.xlane.xlu0 %2674 }
 0xd12   : > { %vm2695_vm5 = vcmp.eq.f32.partialorder %v4285_v0, %v2675_v34 }
 0xd13   : > { %v3264_v33 = vsel %vm2695_vm5, 1.0, %v3949_v39 }
 0xd14   : > { %3753 = vmatmul.mubr.msk.f32.vlgmr.msra.gmra.mxu1 %vm773_vm1, %v3264_v33 }
 0xd15   : > { %v2681_v2 = vpop.xlane.xlu0 %2680  ;;  %3755 = vmatprep.mubr.msk.f32.mxu1 %vm773_vm1, %v3265_v31 }
 0xd16   : > { %vm2697_vm6 = vcmp.eq.f32.partialorder %v4285_v0, %v2681_v2 }
 0xd17   : > { %v3266_v36 = vsel %vm2697_vm6, 1.0, %v3949_v39 }
 0xd18   : > { %3756 = vmatmul.mubr.msk.f32.gmra.mxu1 %vm773_vm1, %v3266_v36 }
 0xd19   : > { %v2684_v61 = vpop.xlane.xlu1 %2683 }
 0xd1a   : > { %vm2698_vm7 = vcmp.eq.f32.partialorder %v4285_v0, %v2684_v61 }
 0xd1b   : > { %v3267_v59 = vsel %vm2698_vm7, 1.0, %v3949_v39 }
 0xd1c   : > { %3758 = vmatprep.mubr.msk.f32.mxu1 %vm773_vm1, %v3267_v59 }
 0xd1d   : > { %v2687_v37 = vpop.xlane.xlu0 %2686 }
 0xd1e   : > { %vm2699_vm8 = vcmp.eq.f32.partialorder %v4285_v0, %v2687_v37  ;;  %v2690_v38 = vpop.xlane.xlu1 %2689 }
 0xd1f   : > { %v3268_v40 = vsel %vm2699_vm8, 1.0, %v3949_v39  ;;  %vm2700_vm9 = vcmp.eq.f32.partialorder %v4285_v0, %v2690_v38 }
 0xd20   : > { %v3269_v49 = vsel %vm2700_vm9, 1.0, %v3949_v39  ;;  %3759 = vmatmul.mubr.msk.f32.gmra.mxu1 %vm773_vm1, %v3268_v40 }
 0xd21   : > { %v2693_v50 = vpop.xlane.xlu0 %2692  ;;  %3761 = vmatprep.mubr.msk.f32.mxu1 %vm773_vm1, %v3269_v49 }
 0xd22   : > { %vm2701_vm10 = vcmp.eq.f32.partialorder %v4285_v0, %v2693_v50  ;;  %v5135_v0 = vpop.f32.mrf.mxu0 }
 0xd23   : > { %v3270_v47 = vsel %vm2701_vm10, 1.0, %v3949_v39  ;;  %5378 = vst [vmem:[#allocation21_spill] sm:$0xff] %v5135_v0  ;;  %v5137_v39 = vpop.f32.mrf.mxu1 }
 0xd24   : > { %3762 = vmatmul.mubr.msk.f32.gmra.mxu1 %vm773_vm1, %v3270_v47  ;;  %v5139_v14 = vpop.f32.mrf.mxu0 }
 0xd25   : > { %5379 = vst [vmem:[#allocation22_spill] sm:$0xff] %v5139_v14  ;;  %v5141_v51 = vpop.f32.mrf.mxu1 }
 0xd26   : > { %v5143_v62 = vpop.f32.mrf.mxu0 }
 0xd27   : > { %5380 = vst [vmem:[#allocation23_spill] sm:$0xff] %v5143_v62  ;;  %v5145_v1 = vpop.f32.mrf.mxu1 }
 0xd28   : > { %v5147_v8 = vpop.f32.mrf.mxu0 }
 0xd29   : > { %5381 = vst [vmem:[#allocation24_spill] sm:$0xff] %v5147_v8  ;;  %v5149_v5 = vpop.f32.mrf.mxu1  ;;  %v5205_v8 = vld [vmem:[%s5341_s5] ss:$0 sm:$0xff] }
 0xd2a   : > { %v3558_v18 = vpop.f32.mrf.mxu0 }
 0xd2b   : > { %v5151_v32 = vpop.f32.mrf.mxu1  ;;  %v1217_v62 = vmax.f32 %v3530_v22, %v3558_v18 }
 0xd2c   : > { %v1177_v16 = vpop.f32.mrf.mxu0 }
 0xd2d   : > { %v5153_v21 = vpop.f32.mrf.mxu1 }
 0xd2e   : > { %v3561_v35 = vpop.f32.mrf.mxu0 }
 0xd2f   : > { %v5155_v54 = vpop.f32.mrf.mxu1 }
 0xd30   : > { %v1187_v56 = vpop.f32.mrf.mxu0 }
 0xd31   : > { %v3586_v53 = vpop.f32.mrf.mxu1 }
 0xd32   : > { %v5157_v20 = vpop.f32.mrf.mxu0 }
 0xd33   : > { %v1410_v19 = vpop.f32.mrf.mxu1 }
 0xd34   : > { %v5159_v27 = vpop.f32.mrf.mxu0 }
 0xd35   : > { %v3589_v26 = vpop.f32.mrf.mxu1 }
 0xd36   : > { %v5161_v52 = vpop.f32.mrf.mxu0 }
 0xd37   : > { %v1420_v57 = vpop.f32.mrf.mxu1 }
 0xd38   : > { %v5163_v30 = vpop.f32.mrf.mxu0 }
 0xd39   : > { %v5165_v29 = vpop.f32.mrf.mxu1 }
 0xd3a   : > { %v3614_v63 = vpop.f32.mrf.mxu0 }
 0xd3b   : > { %v5167_v46 = vpop.f32.mrf.mxu1 }
 0xd3c   : > { %v1643_v15 = vpop.f32.mrf.mxu0 }
 0xd3d   : > { %v5169_v60 = vpop.f32.mrf.mxu1 }
 0xd3e   : > { %v3617_v55 = vpop.f32.mrf.mxu0 }
 0xd3f   : > { %v5171_v34 = vpop.f32.mrf.mxu1 }
 0xd40   : > { %v1653_v33 = vpop.f32.mrf.mxu0 }
 0xd41   : > { %v3642_v31 = vpop.f32.mrf.mxu1 }
 0xd42   : > { %v5173_v2 = vpop.f32.mrf.mxu0 }
 0xd43   : > { %v1876_v36 = vpop.f32.mrf.mxu1 }
 0xd44   : > { %v5175_v61 = vpop.f32.mrf.mxu0 }
 0xd45   : > { %v3645_v59 = vpop.f32.mrf.mxu1 }
 0xd46   : > { %v5177_v37 = vpop.f32.mrf.mxu0 }
 0xd47   : > { %5382 = vst [vmem:[#allocation25_spill] sm:$0xff] %v5177_v37  ;;  %v1886_v38 = vpop.f32.mrf.mxu1 }
 0xd48   : > { %v5179_v40 = vpop.f32.mrf.mxu0 }
 0xd49   : > { %5383 = vst [vmem:[#allocation26_spill] sm:$0xff] %v5179_v40  ;;  %v5181_v49 = vpop.f32.mrf.mxu1 }
 0xd4a   : > { %v3670_v50 = vpop.f32.mrf.mxu0 }
 0xd4b   : > { %v5183_v47 = vpop.f32.mrf.mxu1 }
 0xd4c   : > { %5384 = vst [vmem:[#allocation27_spill] sm:$0xff] %v5183_v47  ;;  %v2109_v48 = vpop.f32.mrf.mxu0 }
 0xd4d   : > { %v5185_v13 = vpop.f32.mrf.mxu1 }
 0xd4e   : > { %5385 = vst [vmem:[#allocation28_spill] sm:$0xff] %v5185_v13  ;;  %v3673_v12 = vpop.f32.mrf.mxu0  ;;  %v1216_v13 = vmax.f32 %v5137_v39, %v1177_v16  ;;  %v5211_v39 = vadd.f32 %v5124_v17, %v5205_v8  ;;  %v1221_v17 = vmax.f32 %v5149_v5, %v5157_v20 }
 0xd4f   : > { %v5187_v10 = vpop.f32.mrf.mxu1 }
 0xd50   : > { %5386 = vst [vmem:[#allocation29_spill] sm:$0xff] %v5187_v10  ;;  %v2119_v9 = vpop.f32.mrf.mxu0  ;;  %v1450_v10 = vmax.f32 %v1217_v62, %v3586_v53 }
 0xd51   : > { %v3698_v7 = vpop.f32.mrf.mxu1 }
 0xd52   : > { %v5189_v6 = vpop.f32.mrf.mxu0 }
 0xd53   : > { %5387 = vst [vmem:[#allocation30_spill] sm:$0xff] %v5189_v6  ;;  %v2342_v4 = vpop.f32.mrf.mxu1  ;;  %v1683_v6 = vmax.f32 %v1450_v10, %v3614_v63 }
 0xd54   : > { %v5191_v3 = vpop.f32.mrf.mxu0 }
 0xd55   : > { %5388 = vst [vmem:[#allocation31_spill] sm:$0xff] %v5191_v3  ;;  %v3701_v24 = vpop.f32.mrf.mxu1  ;;  %v1219_v3 = vmax.f32 %v5141_v51, %v3561_v35  ;;  %v1916_v18 = vmax.f32 %v1683_v6, %v3642_v31  ;;  %v764_v6 = vsub.f32 %v5211_v39, %v4199_v25  ;;  %v1220_v25 = vmax.f32 %v5151_v32, %v5159_v27  ;;  %v5397_v39 = vld [vmem:[#allocation26_spill] sm:$0xff] }
 0xd56   : > { %v5193_v44 = vpop.f32.mrf.mxu0 }
 0xd57   : > { %5389 = vst [vmem:[#allocation32_spill] sm:$0xff] %v5193_v44  ;;  %v2352_v43 = vpop.f32.mrf.mxu1  ;;  %v1449_v44 = vmax.f32 %v1216_v13, %v1410_v19  ;;  %v2149_v37 = vmax.f32 %v1916_v18, %v3670_v50  ;;  %v735_v13 = vadd.f32 %v5205_v8, %v5133_v11  ;;  %v5396_v18 = vld [vmem:[#allocation24_spill] sm:$0xff] }
 0xd58   : > { %v5195_v0 = vpop.f32.mrf.mxu0 }
 0xd59   : > { %5390 = vst [vmem:[#allocation33_spill] sm:$0xff] %v5195_v0  ;;  %v5197_v45 = vpop.f32.mrf.mxu1  ;;  %v1218_v0 = vmax.f32 %v5145_v1, %v1187_v56  ;;  %v1682_v22 = vmax.f32 %v1449_v44, %v1643_v15  ;;  %v732_v44 = vadd.f32 %v5205_v8, %v5126_v58 }
 0xd5a   : > { %5391 = vst [vmem:[#allocation34_spill] sm:$0xff] %v5197_v45  ;;  %v3726_v14 = vpop.f32.mrf.mxu0  ;;  %v1452_v45 = vmax.f32 %v1219_v3, %v3589_v26  ;;  %v2382_v3 = vmax.f32 %v2149_v37, %v3698_v7  ;;  %v743_v26 = vadd.f32 %v5128_v28, %v5205_v8  ;;  %v763_v7 = vsub.f32 %v735_v13, %v4208_v23  ;;  %v5393_v37 = vld [vmem:[#allocation25_spill] sm:$0xff] }
 0xd5b   : > { %v5200_v40 = vpop.f32.mrf.mxu1  ;;  %v1451_v16 = vmax.f32 %v1218_v0, %v1420_v57  ;;  %v1454_v57 = vmax.f32 %v1221_v17, %v5165_v29  ;;  %v1453_v28 = vmax.f32 %v1220_v25, %v5167_v46 }
 0xd5c   : > { %5392 = vst [vmem:[#allocation35_spill] sm:$0xff] %v5200_v40  ;;  %v2575_v47 = vpop.f32.mrf.mxu0  ;;  %v1685_v53 = vmax.f32 %v1452_v45, %v3617_v55  ;;  %v1915_v40 = vmax.f32 %v1682_v22, %v1876_v36  ;;  %v2615_v11 = vmax.f32 %v2382_v3, %v3726_v14 }
 0xd5d   : > { %v5213_v62 = vpop.f32.mrf.mxu1  ;;  %v1684_v51 = vmax.f32 %v1451_v16, %v1653_v33  ;;  %v1687_v23 = vmax.f32 %v1454_v57, %v5173_v2 }
 0xd5e   : > { %v3729_v10 = vpop.f32.mrf.mxu0  ;;  %v1918_v35 = vmax.f32 %v1685_v53, %v3645_v59  ;;  %v2148_v1 = vmax.f32 %v1915_v40, %v2109_v48  ;;  %v5394_v40 = vld [vmem:[#allocation27_spill] sm:$0xff]  ;;  %v5398_v53 = vld [vmem:[#allocation28_spill] sm:$0xff] }
 0xd5f   : > { %v5223_v45 = vpop.f32.mrf.mxu1  ;;  %v1917_v0 = vmax.f32 %v1684_v51, %v1886_v38  ;;  %v1920_v36 = vmax.f32 %v1687_v23, %v5181_v49 }
 0xd60   : > { %v2151_v56 = vmax.f32 %v1918_v35, %v3673_v12  ;;  %v2381_v19 = vmax.f32 %v2148_v1, %v2342_v4  ;;  %v2585_v58 = vpop.f32.mrf.mxu0  ;;  %v762_v12 = vsub.f32 %v732_v44, %v4202_v41  ;;  %v1223_v4 = vmax.f32 %v5153_v21, %v5161_v52  ;;  %v5401_v44 = vld [vmem:[#allocation22_spill] sm:$0xff] }
 0xd61   : > { %v2150_v15 = vmax.f32 %v1917_v0, %v2119_v9  ;;  %v1222_v9 = vmax.f32 %v5155_v54, %v5163_v30  ;;  %v1686_v41 = vmax.f32 %v1453_v28, %v5175_v61  ;;  %v765_v52 = vsub.f32 %v743_v26, %v4204_v42  ;;  %v5400_v51 = vld [vmem:[#allocation34_spill] sm:$0xff]  ;;  %v5402_v0 = vld [vmem:[#allocation29_spill] sm:$0xff] }
 0xd62   : > { %v2384_v5 = vmax.f32 %v2151_v56, %v3701_v24  ;;  %v2614_v20 = vmax.f32 %v2381_v19, %v2575_v47  ;;  %v3732_v14 = vpop.f32.mrf.mxu0  ;;  %v1456_v24 = vmax.f32 %v1223_v4, %v5169_v60  ;;  %v5395_v47 = vld [vmem:[#allocation30_spill] sm:$0xff]  ;;  %v751_v42 = vadd.f32 %v5205_v8, %v5396_v18  ;;  %v5403_v19 = vld [vmem:[#allocation32_spill] sm:$0xff]  ;;  %v3279_v18 = vld [vmem:[%s5343_s7] ss:$0 sm:$0xff] }
 0xd63   : > { %v2383_v32 = vmax.f32 %v2150_v15, %v2352_v43  ;;  %v1455_v43 = vmax.f32 %v1222_v9, %v5171_v34  ;;  %v1919_v50 = vmax.f32 %v1686_v41, %v5394_v40  ;;  %v2153_v54 = vmax.f32 %v1920_v36, %v5395_v47  ;;  %v5399_v34 = vld [vmem:[#allocation31_spill] sm:$0xff] }
 0xd64   : > { %v2617_v27 = vmax.f32 %v2384_v5, %v3729_v10  ;;  %v1689_v38 = vmax.f32 %v1456_v24, %v5393_v37  ;;  %v2595_v30 = vpop.f32.mrf.mxu0  ;;  %v748_v17 = vadd.f32 %v5205_v8, %v5401_v44  ;;  %v5405_v15 = vld [vmem:[#allocation23_spill] sm:$0xff] }
 0xd65   : > { %v2616_v46 = vmax.f32 %v2383_v32, %v2585_v58  ;;  %v1688_v16 = vmax.f32 %v1455_v43, %v5397_v39  ;;  %v2152_v10 = vmax.f32 %v1919_v50, %v5399_v34  ;;  %v2386_v35 = vmax.f32 %v2153_v54, %v5400_v51  ;;  %v5414_v44 = vld [vmem:[#allocation11_spill] sm:$0xff] }
 0xd66   : > { %v1922_v13 = vmax.f32 %v1689_v38, %v5398_v53  ;;  %v3735_v26 = vpop.f32.mrf.mxu0  ;;  %v759_v5 = vadd.f32 %v5405_v15, %v5205_v8  ;;  %v5411_v38 = vld [vmem:[#allocation17_spill] sm:$0xff] }
 0xd67   : > { %v1921_v56 = vmax.f32 %v1688_v16, %v5402_v0  ;;  %v2619_v57 = vmax.f32 %v2386_v35, %v3732_v14  ;;  %v5412_v53 = vld [vmem:[#allocation9_spill] sm:$0xff]  ;;  %v5413_v35 = vld [vmem:[#allocation10_spill] sm:$0xff] }
 0xd68   : > { %v2605_v9 = vpop.f32.mrf.mxu0 }
 0xdd4   : > { %v3754_v63 = vpop.f32.mrf.mxu1 }
 0xdd5   : > { %v2848_v55 = vmax.f32 %v2615_v11, %v3754_v63  ;;  %v2155_v11 = vmax.f32 %v1922_v13, %v5403_v19 }
 0xdd6   : > { %v2808_v33 = vpop.f32.mrf.mxu1 }
 0xdd7   : > { %v2856_v29 = vadd.f32 %v2848_v55, %v763_v7  ;;  %v2847_v31 = vmax.f32 %v2614_v20, %v2808_v33  ;;  %v5404_v7 = vld [vmem:[#allocation35_spill] sm:$0xff]  ;;  %v5406_v20 = vld [vmem:[#allocation20_spill] sm:$0xff]  ;;  %v5407_v55 = vld [vmem:[#allocation33_spill] sm:$0xff]  ;;  %v2388_v28 = vmax.f32 %v2155_v11, %v5213_v62 }
 0xdd8   : > { %v3757_v21 = vpop.f32.mrf.mxu1  ;;  %v2385_v25 = vmax.f32 %v2152_v10, %v5404_v7  ;;  %v5415_v11 = vld [vmem:[#allocation12_spill] sm:$0xff] }
 0xdd9   : > { %v2855_v2 = vadd.f32 %v2847_v31, %v762_v12  ;;  %v2850_v59 = vmax.f32 %v2617_v27, %v3757_v21  ;;  %v2864_v48 = vmax.f32 %v2856_v29, 0.0  ;;  %v2154_v12 = vmax.f32 %v1921_v56, %v5407_v55  ;;  %v5408_v27 = vld [vmem:[#allocation21_spill] sm:$0xff]  ;;  %v5409_v29 = vld [vmem:[#allocation18_spill] sm:$0xff] }
 0xdda   : > { %v2818_v60 = vpop.f32.mrf.mxu1  ;;  %v2618_v23 = vmax.f32 %v2385_v25, %v2595_v30  ;;  %v756_v14 = vadd.f32 %v5408_v27, %v5205_v8  ;;  %v766_v31 = vsub.f32 %v748_v17, %v5409_v29  ;;  %v2621_v36 = vmax.f32 %v2388_v28, %v3735_v26 }
 0xddb   : > { %v2863_v61 = vmax.f32 %v2855_v2, 0.0  ;;  %v2858_v22 = vadd.f32 %v2850_v59, %v765_v52  ;;  %v2849_v49 = vmax.f32 %v2616_v46, %v2818_v60  ;;  %v2387_v41 = vmax.f32 %v2154_v12, %v5223_v45  ;;  %v5410_v2 = vld [vmem:[#allocation19_spill] sm:$0xff] }
 0xddc   : > { %v769_v62 = vsub.f32 %v759_v5, %v5410_v2  ;;  %v768_v40 = vsub.f32 %v756_v14, %v5411_v38  ;;  %v5417_v5 = vld [vmem:[#allocation14_spill] sm:$0xff] }
 0xddd   : > { %v2871_v1 = vpack.c.bf16 %v2864_v48, %v2863_v61  ;;  %v2857_v3 = vadd.f32 %v2849_v49, %v764_v6  ;;  %v2866_v58 = vmax.f32 %v2858_v22, 0.0  ;;  %v767_v6 = vsub.f32 %v751_v42, %v5406_v20 }
 0xdde   : > { %v2620_v59 = vmax.f32 %v2387_v41, %v2605_v9 }
 0xddf   : > { %v2865_v63 = vmax.f32 %v2857_v3, 0.0  ;;  %3768 = vmatprep.mubr.msk.bf16.mxu0 %vm2898_vm11, %v2871_v1 }
 0xde0   : > { %v3760_v4 = vpop.f32.mrf.mxu1 }
 0xde1   : > { %v2872_v33 = vpack.c.bf16 %v2866_v58, %v2865_v63  ;;  %v2852_v32 = vmax.f32 %v2619_v57, %v3760_v4  ;;  %v5416_v57 = vld [vmem:[#allocation13_spill] sm:$0xff]  ;;  %v5419_v4 = vld [vmem:[#allocation16_spill] sm:$0xff] }
 0xde2   : > { %v2828_v24 = vpop.f32.mrf.mxu1 }
 0xde3   : > { %v2860_v21 = vadd.f32 %v2852_v32, %v767_v6  ;;  %v2851_v52 = vmax.f32 %v2618_v23, %v2828_v24  ;;  %3769 = vmatmul.mubr.msk.bf16.vlgmr.msra.gmra.mxu0 %vm2898_vm11, %v2872_v33  ;;  %v5418_v6 = vld [vmem:[#allocation15_spill] sm:$0xff] }
 0xde4   : > { %v3763_v46 = vpop.f32.mrf.mxu1 }
 0xde5   : > { %v2859_v43 = vadd.f32 %v2851_v52, %v766_v31  ;;  %v2854_v37 = vmax.f32 %v2621_v36, %v3763_v46  ;;  %v2868_v50 = vmax.f32 %v2860_v21, 0.0 }
 0xde6   : > { %v2838_v8 = vpop.f32.mrf.mxu1 }
 0xde7   : > { %v2867_v47 = vmax.f32 %v2859_v43, 0.0  ;;  %v2862_v54 = vadd.f32 %v2854_v37, %v769_v62  ;;  %v2853_v30 = vmax.f32 %v2620_v59, %v2838_v8 }
 0xde9   : > { %v2873_v60 = vpack.c.bf16 %v2868_v50, %v2867_v47  ;;  %v2861_v45 = vadd.f32 %v2853_v30, %v768_v40  ;;  %v2870_v48 = vmax.f32 %v2862_v54, 0.0 }
 0xdeb   : > { %v2869_v61 = vmax.f32 %v2861_v45, 0.0  ;;  %3772 = vmatprep.mubr.msk.bf16.mxu0 %vm2898_vm11, %v2873_v60 }
 0xded   : > { %v2874_v22 = vpack.c.bf16 %v2870_v48, %v2869_v61 }
 0xdef   : > { %3773 = vmatmul.mubr.msk.bf16.gmra.mxu0 %vm2898_vm11, %v2874_v22 }
 0xea3   : > { %v3770_v49 = vpop.f32.mrf.mxu0 }
 0xea4   : > { %v2954_v51 = vadd.f32 %v3770_v49, %v3279_v18 }
 0xea5   : > { %v2945_v42 = vpop.f32.mrf.mxu0 }
 0xea6   : > { %v2946_v39 = vadd.f32 %v3279_v18, %v2945_v42  ;;  %v2978_v17 = vadd.f32 %v2954_v51, %v5414_v44 }
 0xea7   : > { %v3771_v16 = vpop.f32.mrf.mxu0 }
 0xea8   : > { %v2976_v13 = vadd.f32 %v2946_v39, %v5412_v53  ;;  %v2957_v0 = vadd.f32 %v3771_v16, %v3279_v18 }
 0xea9   : > { %v2948_v34 = vpop.f32.mrf.mxu0 }
 0xeaa   : > { %v2949_v10 = vadd.f32 %v3279_v18, %v2948_v34  ;;  %2984 = vxpose.xlu1.b32.start [1/8] (short) (narrow) %v2976_v13, 16  ;;  %v2979_v26 = vadd.f32 %v2957_v0, %v5415_v11 }
 0xeac   : > { %v2977_v1 = vadd.f32 %v2949_v10, %v5413_v35 }
 0xeae   : > { %2985 = vxpose.xlu1.b32.cont [2/8] (short) (narrow) %v2977_v1, 16 }
 0xeaf   : > { %v3774_v3 = vpop.f32.mrf.mxu0 }
 0xeb0   : > { %v2970_v15 = vadd.f32 %v3774_v3, %v3279_v18 }
 0xeb1   : > { %v2961_v56 = vpop.f32.mrf.mxu0 }
 0xeb2   : > { %2986 = vxpose.xlu1.b32.cont [3/8] (short) (narrow) %v2978_v17, 16  ;;  %v2962_v7 = vadd.f32 %v3279_v18, %v2961_v56  ;;  %v2982_v55 = vadd.f32 %v2970_v15, %v5418_v6 }
 0xeb3   : > { %v3775_v19 = vpop.f32.mrf.mxu0 }
 0xeb4   : > { %v2980_v58 = vadd.f32 %v2962_v7, %v5416_v57  ;;  %v2973_v12 = vadd.f32 %v3775_v19, %v3279_v18 }
 0xeb5   : > { %v2964_v25 = vpop.f32.mrf.mxu0 }
 0xeb6   : > { %2987 = vxpose.xlu1.b32.cont [4/8] (short) (narrow) %v2979_v26, 16  ;;  %v2965_v63 = vadd.f32 %v3279_v18, %v2964_v25  ;;  %v2983_v28 = vadd.f32 %v2973_v12, %v5419_v4 }
 0xeb8   : > { %v2981_v20 = vadd.f32 %v2965_v63, %v5417_v5 }
 0xeba   : > { %2988 = vxpose.xlu1.b32.cont [5/8] (short) (narrow) %v2980_v58, 16 }
 0xebe   : > { %2989 = vxpose.xlu1.b32.cont [6/8] (short) (narrow) %v2981_v20, 16 }
 0xec2   : > { %2990 = vxpose.xlu1.b32.cont [7/8] (short) (narrow) %v2982_v55, 16 }
 0xec6   : > { %2991 = vxpose.xlu1.b32.end [8/8] (short) (narrow) %v2983_v28, 16 }
 0xf26   : > { %v3000_v23 = vpop.trf.xlu1 }
 0xf27   : > { %3016 = vst.msk [vmem:[%s323_s12] sm:$0xff] %vm773_vm1, %v3000_v23 }
 0xf2a   : > { %v3001_v33 = vpop.trf.xlu1 }
 0xf2b   : > { %3017 = vst.msk [vmem:[%s323_s12 + $0x8] sm:$0xff] %vm773_vm1, %v3001_v33 }
 0xf2c   : > { %3893 = shalt.err (!%p3890_p10)
}
 0xf2d   : > { %s3894_s26 = scalar_lea.hbm %s5292_s22, 256  ;;  %s3898_s12 = scalar_lea.hbm %s5344_s8, 512 }
 0xf2e   : > { %p3895_p0 = scmp.ne.s32.totalorder %s5292_s22, %s3894_s26  ;;  %p3899_p1 = scmp.lt.s32.totalorder %s5292_s22, %s5344_s8 }
 0xf2f   : > { %p3900_p3 = scmp.lt.s32.totalorder %s3898_s12, %s3894_s26 }
 0xf30   : > { %p3896_p2 = pnand %p3895_p0, %p5420_p12 }
 0xf31   : > { %p3901_p6 = por %p3900_p3, %p3899_p1 }
 0xf32   : > { %p3897_p9 = pneg %p3896_p2 }
 0xf34   : > { %p3902_p11 = pnand %p3901_p6, %p3897_p9 }
 0xf36   : > { %3905 = shalt.err (!%p3902_p11)
}
 0xf37   : > { %s3951_s13 = smov 128   ;;  %s3952_s21 = smov 8  }
 0xf38   : > { %3782 = dma.vmem_to_hbm [thread:$0]  (%p5420_p12), %s5286_s19, 256, %s5292_s22, %s3019_s15, %s3951_s13, %s3951_s13, %s3952_s21  }
 0xf39 PF: > { %s3047_s9 = sand.u32 1, %s3932_s27   ;;  %p5421_p13 = scmp.ne.s32.totalorder %s5363_s18, 0 }
 0xf3a   : > { %p5422_p4 = scmp.ge.s32.totalorder %s3944_s30, 2  ;;  %s3048_s23 = scalar_lea.sflag [#allocation4], %s3047_s9 }
 0xf3c   : > { %p3789_p5 = pnand %p5422_p4, %p5421_p13 }
 0xf3e   : > { %p3790_p7 = pneg %p3789_p5 }
 0xf40   : > { %3927 = dma.done.wait (%p3790_p7), %s3048_s23, 256  }
 0xf41   : > { %3929 = vsyncadd (%p3790_p7), %s3048_s23, 4294967040  ;;  %s5423_s24 = sld [smem:[#allocation8_spill]]  ;;  %p21_p8 = scmp.ge.s32.totalorder %s4023_s11, 4  }
 0xf42   : > { %s5424_s27 = smov %s3936_s28  ;;  %s5425_s28 = smov %s3940_s29 }
 0xf43   : > { %s5427_s30 = smov %s4023_s11  ;;  %23 = sbr.rel (!%p21_p8) target bundleno = 5 (0x5), region = 97 }
 0xf47   : > { %s5426_s29 = smov %s5423_s24 }
 0xf48   :  { %3053 = vsyncpa [#allocation3], 1 }
 0xf49   :  { %3055 = vsyncpa [#allocation3 + $0x1], 1 }
 0xf4a   :  { %3056 = vsyncpa [#allocation4], 1 }
 0xf4b   :  { %3058 = vsyncpa [#allocation4 + $0x1], 1 }

</bundles_post_ra>
